<compile_context>
chip_gen: v7x
topology: tpu7x:2x2x1
jax: 0.10.0
libtpu: 0.0.40
codegen_flags: <defaults>
</compile_context>

<pallas_src>
import jax
import jax.numpy as jnp
import numpy as np
from jax.experimental import pallas as pl
from jax.experimental.pallas import tpu as pltpu


def _encoder_kernel(x_ref, mask_ref, we_ref, be_ref, wih_ref, bih_ref, whh_ref,
                    out_ref, hid_ref, seq_ref):
    """All refs live in VMEM.

    x_ref    : (T*B, 768) time-major input rows (row = t*B + b)
    mask_ref : (T, B, 2H) float; [..., :H] = (t < len), [..., H:] = (T-1-t < len)
    we_ref   : (768, E)   embedding weight,  be_ref: (1, E) bias
    wih_ref  : (E, 8H)    fused input->gate weight  [fwd i,f,g,o | bwd i,f,g,o]
    bih_ref  : (1, 8H)    fused bias (b_ih + b_hh, per direction)
    whh_ref  : (2H, 8H)   block-diagonal recurrent weight
    out_ref  : (T, B, 2H) LayerNormed sequence output (time-major)
    hid_ref  : (B, 2H)    final hidden = [h_n fwd | h_n bwd]
    seq_ref  : (T, B, 2H) scratch; [t, :, :H] = fwd h(t), [t, :, H:] = bwd h(T-1-t)
    """
    T, B, twoH = mask_ref.shape
    H = twoH // 2
    H4 = 4 * H

    # ---------- Phase 1: embedding + fused input-to-gate projection ----------
    emb = jnp.maximum(
        jnp.dot(x_ref[...], we_ref[...], preferred_element_type=jnp.float32)
        + be_ref[...], 0.0)                                           # (T*B, E)
    xw = (jnp.dot(emb, wih_ref[...], preferred_element_type=jnp.float32)
          + bih_ref[...])                                             # (T*B, 8H)

    # ---------- Phase 2: fused bidirectional LSTM recurrence ----------
    whh = whh_ref[...]                                                # (2H, 8H)
    h_cat = jnp.zeros((B, twoH), jnp.float32)                         # [h_f | h_b]
    c_cat = jnp.zeros((B, twoH), jnp.float32)

    for t in range(T):                        # fully unrolled; T is small/static
        tb = T - 1 - t
        g = jnp.dot(h_cat, whh, preferred_element_type=jnp.float32)   # (B, 8H)
        gf = g[:, :H4] + xw[t * B:(t + 1) * B, :H4]        # fwd gates @ time t
        gb = g[:, H4:] + xw[tb * B:(tb + 1) * B, H4:]      # bwd gates @ time tb
        # regroup by gate type so the state math runs fused over (B, 2H)
        i = jax.nn.sigmoid(jnp.concatenate([gf[:, 0:H], gb[:, 0:H]], axis=-1))
        f = jax.nn.sigmoid(jnp.concatenate([gf[:, H:2 * H], gb[:, H:2 * H]], axis=-1))
        gg = jnp.tanh(jnp.concatenate([gf[:, 2 * H:3 * H], gb[:, 2 * H:3 * H]], axis=-1))
        o = jax.nn.sigmoid(jnp.concatenate([gf[:, 3 * H:4 * H], gb[:, 3 * H:4 * H]], axis=-1))
        c_new = f * c_cat + i * gg
        h_new = o * jnp.tanh(c_new)
        m = mask_ref[t] > 0.5                      # (B, 2H) bool
        c_cat = jnp.where(m, c_new, c_cat)         # padded steps keep old state
        h_cat = jnp.where(m, h_new, h_cat)
        seq_ref[t] = jnp.where(m, h_new, 0.0)      # padded outputs are exactly 0

    hid_ref[...] = h_cat                           # = cat(h_n[0], h_n[1])

    # ------- Phase 3: LayerNorm (elementwise_affine=False, eps=1e-5), per t -------
    inv = 1.0 / float(twoH)
    for t in range(T):
        fwd = seq_ref[t]                           # fwd h at time t   in [:, :H]
        bwd = seq_ref[T - 1 - t]                   # bwd h at time t   in [:, H:]
        s = jnp.concatenate([fwd[:, :H], bwd[:, H:]], axis=-1)         # (B, 2H)
        mu = jnp.sum(s, axis=-1, keepdims=True) * inv
        d = s - mu
        var = jnp.sum(d * d, axis=-1, keepdims=True) * inv
        out_ref[t] = d * jax.lax.rsqrt(var + 1e-5)


@jax.jit
def encoder_qns_forward(qns, qns_lengths, params):
    """qns: (B, T, 768) float32; qns_lengths: (B,) int32 with max(lengths) == T."""
    B, T, D = qns.shape
    H = params["Whh_f"].shape[0]

    # time-major 2-D view of the input: row = t*B + b (done in XLA, cheap)
    x2 = jnp.transpose(qns, (1, 0, 2)).reshape(T * B, D).astype(jnp.float32)

    # fused weights (cheap XLA concats)
    wih = jnp.concatenate([params["Wih_f"], params["Wih_b"]], axis=1)      # (E, 8H)
    bih = jnp.concatenate([params["b_f"], params["b_b"]], axis=1)          # (1, 8H)
    z = jnp.zeros((H, 4 * H), jnp.float32)
    whh = jnp.concatenate(
        [jnp.concatenate([params["Whh_f"], z], axis=1),
         jnp.concatenate([z, params["Whh_b"]], axis=1)], axis=0)           # (2H, 8H)

    # fused step mask: [:, :, :H] fwd valid at time t, [:, :, H:] bwd valid at T-1-t
    t_idx = jnp.arange(T)
    m_f = (t_idx[:, None] < qns_lengths[None, :]).astype(jnp.float32)      # (T, B)
    m_b = ((T - 1 - t_idx)[:, None] < qns_lengths[None, :]).astype(jnp.float32)
    mask = jnp.concatenate(
        [jnp.broadcast_to(m_f[:, :, None], (T, B, H)),
         jnp.broadcast_to(m_b[:, :, None], (T, B, H))], axis=-1)           # (T, B, 2H)

    vmem = pl.BlockSpec(memory_space=pltpu.MemorySpace.VMEM)
    out_t, hid = pl.pallas_call(
        _encoder_kernel,
        out_shape=(jax.ShapeDtypeStruct((T, B, 2 * H), jnp.float32),
                   jax.ShapeDtypeStruct((B, 2 * H), jnp.float32)),
        in_specs=[vmem] * 7,
        out_specs=(vmem, vmem),
        scratch_shapes=[pltpu.VMEM((T, B, 2 * H), jnp.float32)],
        compiler_params=pltpu.CompilerParams(vmem_limit_bytes=32 * 1024 * 1024),
    )(x2, mask, params["We"], params["be"], wih, bih, whh)

    # back to batch_first (pad_packed_sequence length == max(lengths) == T here)
    return jnp.transpose(out_t, (1, 0, 2)), hid


def reference_forward(qns, lengths, p):
    """Pure-JAX reference matching the PyTorch forward (eval mode)."""
    B, T, _ = qns.shape
    H = p["Whh_f"].shape[0]
    hi = jax.lax.Precision.HIGHEST
    emb = jax.nn.relu(jnp.einsum("btd,de->bte", qns, p["We"], precision=hi)
                      + p["be"][0])

    def run_dir(Wih, Whh, b, reverse):
        def step(carry, t):
            h, c = carry
            x_t = emb[:, t, :]
            g = (jnp.dot(x_t, Wih, precision=hi)
                 + jnp.dot(h, Whh, precision=hi) + b[0])
            i = jax.nn.sigmoid(g[:, :H])
            f = jax.nn.sigmoid(g[:, H:2 * H])
            gg = jnp.tanh(g[:, 2 * H:3 * H])
            o = jax.nn.sigmoid(g[:, 3 * H:])
            c_new = f * c + i * gg
            h_new = o * jnp.tanh(c_new)
            m = (t < lengths).astype(jnp.float32)[:, None]
            return (m * h_new + (1 - m) * h, m * c_new + (1 - m) * c), m * h_new

        ts = jnp.arange(T)
        if reverse:
            ts = ts[::-1]
        (h, _), outs = jax.lax.scan(
            step, (jnp.zeros((B, H), jnp.float32), jnp.zeros((B, H), jnp.float32)), ts)
        outs = jnp.transpose(outs, (1, 0, 2))
        if reverse:
            outs = outs[:, ::-1, :]
        return outs, h

    of, hf = run_dir(p["Wih_f"], p["Whh_f"], p["b_f"], False)
    ob, hb = run_dir(p["Wih_b"], p["Whh_b"], p["b_b"], True)
    seq = jnp.concatenate([of, ob], axis=-1)
    mu = seq.mean(-1, keepdims=True)
    var = ((seq - mu) ** 2).mean(-1, keepdims=True)
    return (seq - mu) * jax.lax.rsqrt(var + 1e-5), jnp.concatenate([hf, hb], -1)


if __name__ == "__main__":
    # Module config implied by forward(): bidirectional=True, n_layers=1, LSTM.
    B, T, D_IN, E, H = 2, 8, 768, 32, 32

    key = jax.random.PRNGKey(0)
    k = jax.random.split(key, 12)
    xavier_std = float(np.sqrt(2.0 / (D_IN + E)))
    bound_lin = 1.0 / float(np.sqrt(D_IN))
    bound_rnn = 1.0 / float(np.sqrt(H))
    uni = lambda kk, shape, b: jax.random.uniform(kk, shape, jnp.float32, -b, b)

    params = {
        # embedding Linear (stored transposed vs. torch: (768, E)), xavier_normal_
        "We": xavier_std * jax.random.normal(k[0], (D_IN, E), jnp.float32),
        "be": uni(k[1], (1, E), bound_lin),
        # LSTM weights (transposed vs. torch), combined bias = b_ih + b_hh
        "Wih_f": uni(k[2], (E, 4 * H), bound_rnn),
        "Whh_f": uni(k[3], (H, 4 * H), bound_rnn),
        "b_f": uni(k[4], (1, 4 * H), bound_rnn) + uni(k[5], (1, 4 * H), bound_rnn),
        "Wih_b": uni(k[6], (E, 4 * H), bound_rnn),
        "Whh_b": uni(k[7], (H, 4 * H), bound_rnn),
        "b_b": uni(k[8], (1, 4 * H), bound_rnn) + uni(k[9], (1, 4 * H), bound_rnn),
    }

    qns = jax.random.normal(k[10], (B, T, D_IN), jnp.float32)
    qns_lengths = jnp.array([T, T - 3], dtype=jnp.int32)   # max length == T

    out, hid = encoder_qns_forward(qns, qns_lengths, params)
    jax.block_until_ready((out, hid))

    # Correctness check against pure-JAX reference of the PyTorch semantics.
    ref_out, ref_hid = reference_forward(qns, qns_lengths, params)
    np.testing.assert_allclose(np.asarray(out), np.asarray(ref_out),
                               atol=1e-2, rtol=1e-2)
    np.testing.assert_allclose(np.asarray(hid), np.asarray(ref_hid),
                               atol=1e-2, rtol=1e-2)
    assert out.shape == (B, T, 2 * H) and hid.shape == (B, 2 * H)

    print("KERNEL_OK")
</pallas_src>

<mosaic_0001>
module attributes {stable_mosaic.version = 11 : i64} {
  func.func @_encoder_kernel(%arg0: memref<16x768xf32, #tpu.memory_space<vmem>>, %arg1: memref<8x2x64xf32, #tpu.memory_space<vmem>>, %arg2: memref<768x32xf32, #tpu.memory_space<vmem>>, %arg3: memref<1x32xf32, #tpu.memory_space<vmem>>, %arg4: memref<32x256xf32, #tpu.memory_space<vmem>>, %arg5: memref<1x256xf32, #tpu.memory_space<vmem>>, %arg6: memref<64x256xf32, #tpu.memory_space<vmem>>, %arg7: memref<8x2x64xf32, #tpu.memory_space<vmem>>, %arg8: memref<2x64xf32, #tpu.memory_space<vmem>>, %arg9: memref<8x2x64xf32, #tpu.memory_space<vmem>>) attributes {dimension_semantics = [], scalar_prefetch = 0 : i64, scratch_operands = 1 : i64, tpu.core_type = #tpu.core_type<tc>} {
    %c0 = arith.constant 0 : index
    %c0_0 = arith.constant 0 : index
    %0 = vector.load %arg0[%c0, %c0_0] : memref<16x768xf32, #tpu.memory_space<vmem>>, vector<16x768xf32>
    %c0_1 = arith.constant 0 : index
    %c0_2 = arith.constant 0 : index
    %1 = vector.load %arg2[%c0_1, %c0_2] : memref<768x32xf32, #tpu.memory_space<vmem>>, vector<768x32xf32>
    %cst = arith.constant dense<0.000000e+00> : vector<16x32xf32>
    %2 = tpu.matmul %0, %1, %cst {dimension_numbers = #tpu.dot_dimension_numbers<[1], [0], [0], [1], [0, 0, 1, 1], [], []>} : vector<16x768xf32>, vector<768x32xf32>, vector<16x32xf32> -> vector<16x32xf32>
    %c0_3 = arith.constant 0 : index
    %c0_4 = arith.constant 0 : index
    %3 = vector.load %arg3[%c0_3, %c0_4] : memref<1x32xf32, #tpu.memory_space<vmem>>, vector<1x32xf32>
    %4 = vector.broadcast %3 : vector<1x32xf32> to vector<16x32xf32>
    %5 = arith.addf %2, %4 : vector<16x32xf32>
    %cst_5 = arith.constant 0.000000e+00 : f32
    %6 = vector.broadcast %cst_5 : f32 to vector<16x32xf32>
    %7 = arith.maximumf %5, %6 : vector<16x32xf32>
    %c0_6 = arith.constant 0 : index
    %c0_7 = arith.constant 0 : index
    %8 = vector.load %arg4[%c0_6, %c0_7] : memref<32x256xf32, #tpu.memory_space<vmem>>, vector<32x256xf32>
    %cst_8 = arith.constant dense<0.000000e+00> : vector<16x256xf32>
    %9 = tpu.matmul %7, %8, %cst_8 {dimension_numbers = #tpu.dot_dimension_numbers<[1], [0], [0], [1], [0, 0, 1, 1], [], []>} : vector<16x32xf32>, vector<32x256xf32>, vector<16x256xf32> -> vector<16x256xf32>
    %c0_9 = arith.constant 0 : index
    %c0_10 = arith.constant 0 : index
    %10 = vector.load %arg5[%c0_9, %c0_10] : memref<1x256xf32, #tpu.memory_space<vmem>>, vector<1x256xf32>
    %11 = vector.broadcast %10 : vector<1x256xf32> to vector<16x256xf32>
    %12 = arith.addf %9, %11 : vector<16x256xf32>
    %c0_11 = arith.constant 0 : index
    %c0_12 = arith.constant 0 : index
    %13 = vector.load %arg6[%c0_11, %c0_12] : memref<64x256xf32, #tpu.memory_space<vmem>>, vector<64x256xf32>
    %cst_13 = arith.constant 0.000000e+00 : f32
    %14 = vector.broadcast %cst_13 : f32 to vector<2x64xf32>
    %cst_14 = arith.constant 0.000000e+00 : f32
    %15 = vector.broadcast %cst_14 : f32 to vector<2x64xf32>
    %cst_15 = arith.constant dense<0.000000e+00> : vector<2x256xf32>
    %16 = tpu.matmul %14, %13, %cst_15 {dimension_numbers = #tpu.dot_dimension_numbers<[1], [0], [0], [1], [0, 0, 1, 1], [], []>} : vector<2x64xf32>, vector<64x256xf32>, vector<2x256xf32> -> vector<2x256xf32>
    %17 = vector.extract_strided_slice %16 {offsets = [0, 0], sizes = [2, 128], strides = [1, 1]} : vector<2x256xf32> to vector<2x128xf32>
    %18 = vector.extract_strided_slice %12 {offsets = [0, 0], sizes = [2, 128], strides = [1, 1]} : vector<16x256xf32> to vector<2x128xf32>
    %19 = arith.addf %17, %18 : vector<2x128xf32>
    %20 = vector.extract_strided_slice %16 {offsets = [0, 128], sizes = [2, 128], strides = [1, 1]} : vector<2x256xf32> to vector<2x128xf32>
    %21 = vector.extract_strided_slice %12 {offsets = [14, 128], sizes = [2, 128], strides = [1, 1]} : vector<16x256xf32> to vector<2x128xf32>
    %22 = arith.addf %20, %21 : vector<2x128xf32>
    %23 = vector.extract_strided_slice %19 {offsets = [0, 0], sizes = [2, 32], strides = [1, 1]} : vector<2x128xf32> to vector<2x32xf32>
    %24 = vector.extract_strided_slice %22 {offsets = [0, 0], sizes = [2, 32], strides = [1, 1]} : vector<2x128xf32> to vector<2x32xf32>
    %25 = tpu.concatenate %23, %24 in 1 : vector<2x32xf32>, vector<2x32xf32> -> vector<2x64xf32>
    %26 = arith.negf %25 : vector<2x64xf32>
    %27 = math.exp %26 : vector<2x64xf32>
    %cst_16 = arith.constant 1.000000e+00 : f32
    %28 = vector.broadcast %cst_16 : f32 to vector<2x64xf32>
    %29 = arith.addf %28, %27 : vector<2x64xf32>
    %30 = arith.divf %28, %29 : vector<2x64xf32>
    %31 = vector.extract_strided_slice %19 {offsets = [0, 32], sizes = [2, 32], strides = [1, 1]} : vector<2x128xf32> to vector<2x32xf32>
    %32 = vector.extract_strided_slice %22 {offsets = [0, 32], sizes = [2, 32], strides = [1, 1]} : vector<2x128xf32> to vector<2x32xf32>
    %33 = tpu.concatenate %31, %32 in 1 : vector<2x32xf32>, vector<2x32xf32> -> vector<2x64xf32>
    %34 = arith.negf %33 : vector<2x64xf32>
    %35 = math.exp %34 : vector<2x64xf32>
    %cst_17 = arith.constant 1.000000e+00 : f32
    %36 = vector.broadcast %cst_17 : f32 to vector<2x64xf32>
    %37 = arith.addf %36, %35 : vector<2x64xf32>
    %38 = arith.divf %36, %37 : vector<2x64xf32>
    %39 = vector.extract_strided_slice %19 {offsets = [0, 64], sizes = [2, 32], strides = [1, 1]} : vector<2x128xf32> to vector<2x32xf32>
    %40 = vector.extract_strided_slice %22 {offsets = [0, 64], sizes = [2, 32], strides = [1, 1]} : vector<2x128xf32> to vector<2x32xf32>
    %41 = tpu.concatenate %39, %40 in 1 : vector<2x32xf32>, vector<2x32xf32> -> vector<2x64xf32>
    %42 = math.tanh %41 : vector<2x64xf32>
    %43 = vector.extract_strided_slice %19 {offsets = [0, 96], sizes = [2, 32], strides = [1, 1]} : vector<2x128xf32> to vector<2x32xf32>
    %44 = vector.extract_strided_slice %22 {offsets = [0, 96], sizes = [2, 32], strides = [1, 1]} : vector<2x128xf32> to vector<2x32xf32>
    %45 = tpu.concatenate %43, %44 in 1 : vector<2x32xf32>, vector<2x32xf32> -> vector<2x64xf32>
    %46 = arith.negf %45 : vector<2x64xf32>
    %47 = math.exp %46 : vector<2x64xf32>
    %cst_18 = arith.constant 1.000000e+00 : f32
    %48 = vector.broadcast %cst_18 : f32 to vector<2x64xf32>
    %49 = arith.addf %48, %47 : vector<2x64xf32>
    %50 = arith.divf %48, %49 : vector<2x64xf32>
    %51 = arith.mulf %38, %15 : vector<2x64xf32>
    %52 = arith.mulf %30, %42 : vector<2x64xf32>
    %53 = arith.addf %51, %52 : vector<2x64xf32>
    %54 = math.tanh %53 : vector<2x64xf32>
    %55 = arith.mulf %50, %54 : vector<2x64xf32>
    %c0_19 = arith.constant 0 : index
    %c0_20 = arith.constant 0 : index
    %c0_21 = arith.constant 0 : index
    %56 = vector.load %arg1[%c0_19, %c0_20, %c0_21] : memref<8x2x64xf32, #tpu.memory_space<vmem>>, vector<1x2x64xf32>
    %57 = vector.shape_cast %56 : vector<1x2x64xf32> to vector<2x64xf32>
    %cst_22 = arith.constant 5.000000e-01 : f32
    %58 = vector.broadcast %cst_22 : f32 to vector<2x64xf32>
    %59 = arith.cmpf ogt, %57, %58 : vector<2x64xf32>
    %60 = arith.select %59, %53, %15 : vector<2x64xi1>, vector<2x64xf32>
    %61 = arith.select %59, %55, %14 : vector<2x64xi1>, vector<2x64xf32>
    %cst_23 = arith.constant 0.000000e+00 : f32
    %62 = vector.broadcast %cst_23 : f32 to vector<2x64xf32>
    %63 = arith.select %59, %55, %62 : vector<2x64xi1>, vector<2x64xf32>
    %c0_24 = arith.constant 0 : index
    %c0_25 = arith.constant 0 : index
    %c0_26 = arith.constant 0 : index
    %64 = vector.load %arg9[%c0_24, %c0_25, %c0_26] : memref<8x2x64xf32, #tpu.memory_space<vmem>>, vector<1x2x64xf32>
    %65 = vector.shape_cast %64 : vector<1x2x64xf32> to vector<2x64xf32>
    %66 = vector.shape_cast %63 : vector<2x64xf32> to vector<1x2x64xf32>
    tpu.vector_store %arg9[%c0_24, %c0_25, %c0_26], %66 {strides = array<i32>} : memref<8x2x64xf32, #tpu.memory_space<vmem>>, vector<1x2x64xf32>,
    %cst_27 = arith.constant dense<0.000000e+00> : vector<2x256xf32>
    %67 = tpu.matmul %61, %13, %cst_27 {dimension_numbers = #tpu.dot_dimension_numbers<[1], [0], [0], [1], [0, 0, 1, 1], [], []>} : vector<2x64xf32>, vector<64x256xf32>, vector<2x256xf32> -> vector<2x256xf32>
    %68 = vector.extract_strided_slice %67 {offsets = [0, 0], sizes = [2, 128], strides = [1, 1]} : vector<2x256xf32> to vector<2x128xf32>
    %69 = vector.extract_strided_slice %12 {offsets = [2, 0], sizes = [2, 128], strides = [1, 1]} : vector<16x256xf32> to vector<2x128xf32>
    %70 = arith.addf %68, %69 : vector<2x128xf32>
    %71 = vector.extract_strided_slice %67 {offsets = [0, 128], sizes = [2, 128], strides = [1, 1]} : vector<2x256xf32> to vector<2x128xf32>
    %72 = vector.extract_strided_slice %12 {offsets = [12, 128], sizes = [2, 128], strides = [1, 1]} : vector<16x256xf32> to vector<2x128xf32>
    %73 = arith.addf %71, %72 : vector<2x128xf32>
    %74 = vector.extract_strided_slice %70 {offsets = [0, 0], sizes = [2, 32], strides = [1, 1]} : vector<2x128xf32> to vector<2x32xf32>
    %75 = vector.extract_strided_slice %73 {offsets = [0, 0], sizes = [2, 32], strides = [1, 1]} : vector<2x128xf32> to vector<2x32xf32>
    %76 = tpu.concatenate %74, %75 in 1 : vector<2x32xf32>, vector<2x32xf32> -> vector<2x64xf32>
    %77 = arith.negf %76 : vector<2x64xf32>
    %78 = math.exp %77 : vector<2x64xf32>
    %cst_28 = arith.constant 1.000000e+00 : f32
    %79 = vector.broadcast %cst_28 : f32 to vector<2x64xf32>
    %80 = arith.addf %79, %78 : vector<2x64xf32>
    %81 = arith.divf %79, %80 : vector<2x64xf32>
    %82 = vector.extract_strided_slice %70 {offsets = [0, 32], sizes = [2, 32], strides = [1, 1]} : vector<2x128xf32> to vector<2x32xf32>
    %83 = vector.extract_strided_slice %73 {offsets = [0, 32], sizes = [2, 32], strides = [1, 1]} : vector<2x128xf32> to vector<2x32xf32>
    %84 = tpu.concatenate %82, %83 in 1 : vector<2x32xf32>, vector<2x32xf32> -> vector<2x64xf32>
    %85 = arith.negf %84 : vector<2x64xf32>
    %86 = math.exp %85 : vector<2x64xf32>
    %cst_29 = arith.constant 1.000000e+00 : f32
    %87 = vector.broadcast %cst_29 : f32 to vector<2x64xf32>
    %88 = arith.addf %87, %86 : vector<2x64xf32>
    %89 = arith.divf %87, %88 : vector<2x64xf32>
    %90 = vector.extract_strided_slice %70 {offsets = [0, 64], sizes = [2, 32], strides = [1, 1]} : vector<2x128xf32> to vector<2x32xf32>
    %91 = vector.extract_strided_slice %73 {offsets = [0, 64], sizes = [2, 32], strides = [1, 1]} : vector<2x128xf32> to vector<2x32xf32>
    %92 = tpu.concatenate %90, %91 in 1 : vector<2x32xf32>, vector<2x32xf32> -> vector<2x64xf32>
    %93 = math.tanh %92 : vector<2x64xf32>
    %94 = vector.extract_strided_slice %70 {offsets = [0, 96], sizes = [2, 32], strides = [1, 1]} : vector<2x128xf32> to vector<2x32xf32>
    %95 = vector.extract_strided_slice %73 {offsets = [0, 96], sizes = [2, 32], strides = [1, 1]} : vector<2x128xf32> to vector<2x32xf32>
    %96 = tpu.concatenate %94, %95 in 1 : vector<2x32xf32>, vector<2x32xf32> -> vector<2x64xf32>
    %97 = arith.negf %96 : vector<2x64xf32>
    %98 = math.exp %97 : vector<2x64xf32>
    %cst_30 = arith.constant 1.000000e+00 : f32
    %99 = vector.broadcast %cst_30 : f32 to vector<2x64xf32>
    %100 = arith.addf %99, %98 : vector<2x64xf32>
    %101 = arith.divf %99, %100 : vector<2x64xf32>
    %102 = arith.mulf %89, %60 : vector<2x64xf32>
    %103 = arith.mulf %81, %93 : vector<2x64xf32>
    %104 = arith.addf %102, %103 : vector<2x64xf32>
    %105 = math.tanh %104 : vector<2x64xf32>
    %106 = arith.mulf %101, %105 : vector<2x64xf32>
    %c1 = arith.constant 1 : index
    %c0_31 = arith.constant 0 : index
    %c0_32 = arith.constant 0 : index
    %107 = vector.load %arg1[%c1, %c0_31, %c0_32] : memref<8x2x64xf32, #tpu.memory_space<vmem>>, vector<1x2x64xf32>
    %108 = vector.shape_cast %107 : vector<1x2x64xf32> to vector<2x64xf32>
    %cst_33 = arith.constant 5.000000e-01 : f32
    %109 = vector.broadcast %cst_33 : f32 to vector<2x64xf32>
    %110 = arith.cmpf ogt, %108, %109 : vector<2x64xf32>
    %111 = arith.select %110, %104, %60 : vector<2x64xi1>, vector<2x64xf32>
    %112 = arith.select %110, %106, %61 : vector<2x64xi1>, vector<2x64xf32>
    %cst_34 = arith.constant 0.000000e+00 : f32
    %113 = vector.broadcast %cst_34 : f32 to vector<2x64xf32>
    %114 = arith.select %110, %106, %113 : vector<2x64xi1>, vector<2x64xf32>
    %c1_35 = arith.constant 1 : index
    %c0_36 = arith.constant 0 : index
    %c0_37 = arith.constant 0 : index
    %115 = vector.load %arg9[%c1_35, %c0_36, %c0_37] : memref<8x2x64xf32, #tpu.memory_space<vmem>>, vector<1x2x64xf32>
    %116 = vector.shape_cast %115 : vector<1x2x64xf32> to vector<2x64xf32>
    %117 = vector.shape_cast %114 : vector<2x64xf32> to vector<1x2x64xf32>
    tpu.vector_store %arg9[%c1_35, %c0_36, %c0_37], %117 {strides = array<i32>} : memref<8x2x64xf32, #tpu.memory_space<vmem>>, vector<1x2x64xf32>,
    %cst_38 = arith.constant dense<0.000000e+00> : vector<2x256xf32>
    %118 = tpu.matmul %112, %13, %cst_38 {dimension_numbers = #tpu.dot_dimension_numbers<[1], [0], [0], [1], [0, 0, 1, 1], [], []>} : vector<2x64xf32>, vector<64x256xf32>, vector<2x256xf32> -> vector<2x256xf32>
    %119 = vector.extract_strided_slice %118 {offsets = [0, 0], sizes = [2, 128], strides = [1, 1]} : vector<2x256xf32> to vector<2x128xf32>
    %120 = vector.extract_strided_slice %12 {offsets = [4, 0], sizes = [2, 128], strides = [1, 1]} : vector<16x256xf32> to vector<2x128xf32>
    %121 = arith.addf %119, %120 : vector<2x128xf32>
    %122 = vector.extract_strided_slice %118 {offsets = [0, 128], sizes = [2, 128], strides = [1, 1]} : vector<2x256xf32> to vector<2x128xf32>
    %123 = vector.extract_strided_slice %12 {offsets = [10, 128], sizes = [2, 128], strides = [1, 1]} : vector<16x256xf32> to vector<2x128xf32>
    %124 = arith.addf %122, %123 : vector<2x128xf32>
    %125 = vector.extract_strided_slice %121 {offsets = [0, 0], sizes = [2, 32], strides = [1, 1]} : vector<2x128xf32> to vector<2x32xf32>
    %126 = vector.extract_strided_slice %124 {offsets = [0, 0], sizes = [2, 32], strides = [1, 1]} : vector<2x128xf32> to vector<2x32xf32>
    %127 = tpu.concatenate %125, %126 in 1 : vector<2x32xf32>, vector<2x32xf32> -> vector<2x64xf32>
    %128 = arith.negf %127 : vector<2x64xf32>
    %129 = math.exp %128 : vector<2x64xf32>
    %cst_39 = arith.constant 1.000000e+00 : f32
    %130 = vector.broadcast %cst_39 : f32 to vector<2x64xf32>
    %131 = arith.addf %130, %129 : vector<2x64xf32>
    %132 = arith.divf %130, %131 : vector<2x64xf32>
    %133 = vector.extract_strided_slice %121 {offsets = [0, 32], sizes = [2, 32], strides = [1, 1]} : vector<2x128xf32> to vector<2x32xf32>
    %134 = vector.extract_strided_slice %124 {offsets = [0, 32], sizes = [2, 32], strides = [1, 1]} : vector<2x128xf32> to vector<2x32xf32>
    %135 = tpu.concatenate %133, %134 in 1 : vector<2x32xf32>, vector<2x32xf32> -> vector<2x64xf32>
    %136 = arith.negf %135 : vector<2x64xf32>
    %137 = math.exp %136 : vector<2x64xf32>
    %cst_40 = arith.constant 1.000000e+00 : f32
    %138 = vector.broadcast %cst_40 : f32 to vector<2x64xf32>
    %139 = arith.addf %138, %137 : vector<2x64xf32>
    %140 = arith.divf %138, %139 : vector<2x64xf32>
    %141 = vector.extract_strided_slice %121 {offsets = [0, 64], sizes = [2, 32], strides = [1, 1]} : vector<2x128xf32> to vector<2x32xf32>
    %142 = vector.extract_strided_slice %124 {offsets = [0, 64], sizes = [2, 32], strides = [1, 1]} : vector<2x128xf32> to vector<2x32xf32>
    %143 = tpu.concatenate %141, %142 in 1 : vector<2x32xf32>, vector<2x32xf32> -> vector<2x64xf32>
    %144 = math.tanh %143 : vector<2x64xf32>
    %145 = vector.extract_strided_slice %121 {offsets = [0, 96], sizes = [2, 32], strides = [1, 1]} : vector<2x128xf32> to vector<2x32xf32>
    %146 = vector.extract_strided_slice %124 {offsets = [0, 96], sizes = [2, 32], strides = [1, 1]} : vector<2x128xf32> to vector<2x32xf32>
    %147 = tpu.concatenate %145, %146 in 1 : vector<2x32xf32>, vector<2x32xf32> -> vector<2x64xf32>
    %148 = arith.negf %147 : vector<2x64xf32>
    %149 = math.exp %148 : vector<2x64xf32>
    %cst_41 = arith.constant 1.000000e+00 : f32
    %150 = vector.broadcast %cst_41 : f32 to vector<2x64xf32>
    %151 = arith.addf %150, %149 : vector<2x64xf32>
    %152 = arith.divf %150, %151 : vector<2x64xf32>
    %153 = arith.mulf %140, %111 : vector<2x64xf32>
    %154 = arith.mulf %132, %144 : vector<2x64xf32>
    %155 = arith.addf %153, %154 : vector<2x64xf32>
    %156 = math.tanh %155 : vector<2x64xf32>
    %157 = arith.mulf %152, %156 : vector<2x64xf32>
    %c2 = arith.constant 2 : index
    %c0_42 = arith.constant 0 : index
    %c0_43 = arith.constant 0 : index
    %158 = vector.load %arg1[%c2, %c0_42, %c0_43] : memref<8x2x64xf32, #tpu.memory_space<vmem>>, vector<1x2x64xf32>
    %159 = vector.shape_cast %158 : vector<1x2x64xf32> to vector<2x64xf32>
    %cst_44 = arith.constant 5.000000e-01 : f32
    %160 = vector.broadcast %cst_44 : f32 to vector<2x64xf32>
    %161 = arith.cmpf ogt, %159, %160 : vector<2x64xf32>
    %162 = arith.select %161, %155, %111 : vector<2x64xi1>, vector<2x64xf32>
    %163 = arith.select %161, %157, %112 : vector<2x64xi1>, vector<2x64xf32>
    %cst_45 = arith.constant 0.000000e+00 : f32
    %164 = vector.broadcast %cst_45 : f32 to vector<2x64xf32>
    %165 = arith.select %161, %157, %164 : vector<2x64xi1>, vector<2x64xf32>
    %c2_46 = arith.constant 2 : index
    %c0_47 = arith.constant 0 : index
    %c0_48 = arith.constant 0 : index
    %166 = vector.load %arg9[%c2_46, %c0_47, %c0_48] : memref<8x2x64xf32, #tpu.memory_space<vmem>>, vector<1x2x64xf32>
    %167 = vector.shape_cast %166 : vector<1x2x64xf32> to vector<2x64xf32>
    %168 = vector.shape_cast %165 : vector<2x64xf32> to vector<1x2x64xf32>
    tpu.vector_store %arg9[%c2_46, %c0_47, %c0_48], %168 {strides = array<i32>} : memref<8x2x64xf32, #tpu.memory_space<vmem>>, vector<1x2x64xf32>,
    %cst_49 = arith.constant dense<0.000000e+00> : vector<2x256xf32>
    %169 = tpu.matmul %163, %13, %cst_49 {dimension_numbers = #tpu.dot_dimension_numbers<[1], [0], [0], [1], [0, 0, 1, 1], [], []>} : vector<2x64xf32>, vector<64x256xf32>, vector<2x256xf32> -> vector<2x256xf32>
    %170 = vector.extract_strided_slice %169 {offsets = [0, 0], sizes = [2, 128], strides = [1, 1]} : vector<2x256xf32> to vector<2x128xf32>
    %171 = vector.extract_strided_slice %12 {offsets = [6, 0], sizes = [2, 128], strides = [1, 1]} : vector<16x256xf32> to vector<2x128xf32>
    %172 = arith.addf %170, %171 : vector<2x128xf32>
    %173 = vector.extract_strided_slice %169 {offsets = [0, 128], sizes = [2, 128], strides = [1, 1]} : vector<2x256xf32> to vector<2x128xf32>
    %174 = vector.extract_strided_slice %12 {offsets = [8, 128], sizes = [2, 128], strides = [1, 1]} : vector<16x256xf32> to vector<2x128xf32>
    %175 = arith.addf %173, %174 : vector<2x128xf32>
    %176 = vector.extract_strided_slice %172 {offsets = [0, 0], sizes = [2, 32], strides = [1, 1]} : vector<2x128xf32> to vector<2x32xf32>
    %177 = vector.extract_strided_slice %175 {offsets = [0, 0], sizes = [2, 32], strides = [1, 1]} : vector<2x128xf32> to vector<2x32xf32>
    %178 = tpu.concatenate %176, %177 in 1 : vector<2x32xf32>, vector<2x32xf32> -> vector<2x64xf32>
    %179 = arith.negf %178 : vector<2x64xf32>
    %180 = math.exp %179 : vector<2x64xf32>
    %cst_50 = arith.constant 1.000000e+00 : f32
    %181 = vector.broadcast %cst_50 : f32 to vector<2x64xf32>
    %182 = arith.addf %181, %180 : vector<2x64xf32>
    %183 = arith.divf %181, %182 : vector<2x64xf32>
    %184 = vector.extract_strided_slice %172 {offsets = [0, 32], sizes = [2, 32], strides = [1, 1]} : vector<2x128xf32> to vector<2x32xf32>
    %185 = vector.extract_strided_slice %175 {offsets = [0, 32], sizes = [2, 32], strides = [1, 1]} : vector<2x128xf32> to vector<2x32xf32>
    %186 = tpu.concatenate %184, %185 in 1 : vector<2x32xf32>, vector<2x32xf32> -> vector<2x64xf32>
    %187 = arith.negf %186 : vector<2x64xf32>
    %188 = math.exp %187 : vector<2x64xf32>
    %cst_51 = arith.constant 1.000000e+00 : f32
    %189 = vector.broadcast %cst_51 : f32 to vector<2x64xf32>
    %190 = arith.addf %189, %188 : vector<2x64xf32>
    %191 = arith.divf %189, %190 : vector<2x64xf32>
    %192 = vector.extract_strided_slice %172 {offsets = [0, 64], sizes = [2, 32], strides = [1, 1]} : vector<2x128xf32> to vector<2x32xf32>
    %193 = vector.extract_strided_slice %175 {offsets = [0, 64], sizes = [2, 32], strides = [1, 1]} : vector<2x128xf32> to vector<2x32xf32>
    %194 = tpu.concatenate %192, %193 in 1 : vector<2x32xf32>, vector<2x32xf32> -> vector<2x64xf32>
    %195 = math.tanh %194 : vector<2x64xf32>
    %196 = vector.extract_strided_slice %172 {offsets = [0, 96], sizes = [2, 32], strides = [1, 1]} : vector<2x128xf32> to vector<2x32xf32>
    %197 = vector.extract_strided_slice %175 {offsets = [0, 96], sizes = [2, 32], strides = [1, 1]} : vector<2x128xf32> to vector<2x32xf32>
    %198 = tpu.concatenate %196, %197 in 1 : vector<2x32xf32>, vector<2x32xf32> -> vector<2x64xf32>
    %199 = arith.negf %198 : vector<2x64xf32>
    %200 = math.exp %199 : vector<2x64xf32>
    %cst_52 = arith.constant 1.000000e+00 : f32
    %201 = vector.broadcast %cst_52 : f32 to vector<2x64xf32>
    %202 = arith.addf %201, %200 : vector<2x64xf32>
    %203 = arith.divf %201, %202 : vector<2x64xf32>
    %204 = arith.mulf %191, %162 : vector<2x64xf32>
    %205 = arith.mulf %183, %195 : vector<2x64xf32>
    %206 = arith.addf %204, %205 : vector<2x64xf32>
    %207 = math.tanh %206 : vector<2x64xf32>
    %208 = arith.mulf %203, %207 : vector<2x64xf32>
    %c3 = arith.constant 3 : index
    %c0_53 = arith.constant 0 : index
    %c0_54 = arith.constant 0 : index
    %209 = vector.load %arg1[%c3, %c0_53, %c0_54] : memref<8x2x64xf32, #tpu.memory_space<vmem>>, vector<1x2x64xf32>
    %210 = vector.shape_cast %209 : vector<1x2x64xf32> to vector<2x64xf32>
    %cst_55 = arith.constant 5.000000e-01 : f32
    %211 = vector.broadcast %cst_55 : f32 to vector<2x64xf32>
    %212 = arith.cmpf ogt, %210, %211 : vector<2x64xf32>
    %213 = arith.select %212, %206, %162 : vector<2x64xi1>, vector<2x64xf32>
    %214 = arith.select %212, %208, %163 : vector<2x64xi1>, vector<2x64xf32>
    %cst_56 = arith.constant 0.000000e+00 : f32
    %215 = vector.broadcast %cst_56 : f32 to vector<2x64xf32>
    %216 = arith.select %212, %208, %215 : vector<2x64xi1>, vector<2x64xf32>
    %c3_57 = arith.constant 3 : index
    %c0_58 = arith.constant 0 : index
    %c0_59 = arith.constant 0 : index
    %217 = vector.load %arg9[%c3_57, %c0_58, %c0_59] : memref<8x2x64xf32, #tpu.memory_space<vmem>>, vector<1x2x64xf32>
    %218 = vector.shape_cast %217 : vector<1x2x64xf32> to vector<2x64xf32>
    %219 = vector.shape_cast %216 : vector<2x64xf32> to vector<1x2x64xf32>
    tpu.vector_store %arg9[%c3_57, %c0_58, %c0_59], %219 {strides = array<i32>} : memref<8x2x64xf32, #tpu.memory_space<vmem>>, vector<1x2x64xf32>,
    %cst_60 = arith.constant dense<0.000000e+00> : vector<2x256xf32>
    %220 = tpu.matmul %214, %13, %cst_60 {dimension_numbers = #tpu.dot_dimension_numbers<[1], [0], [0], [1], [0, 0, 1, 1], [], []>} : vector<2x64xf32>, vector<64x256xf32>, vector<2x256xf32> -> vector<2x256xf32>
    %221 = vector.extract_strided_slice %220 {offsets = [0, 0], sizes = [2, 128], strides = [1, 1]} : vector<2x256xf32> to vector<2x128xf32>
    %222 = vector.extract_strided_slice %12 {offsets = [8, 0], sizes = [2, 128], strides = [1, 1]} : vector<16x256xf32> to vector<2x128xf32>
    %223 = arith.addf %221, %222 : vector<2x128xf32>
    %224 = vector.extract_strided_slice %220 {offsets = [0, 128], sizes = [2, 128], strides = [1, 1]} : vector<2x256xf32> to vector<2x128xf32>
    %225 = vector.extract_strided_slice %12 {offsets = [6, 128], sizes = [2, 128], strides = [1, 1]} : vector<16x256xf32> to vector<2x128xf32>
    %226 = arith.addf %224, %225 : vector<2x128xf32>
    %227 = vector.extract_strided_slice %223 {offsets = [0, 0], sizes = [2, 32], strides = [1, 1]} : vector<2x128xf32> to vector<2x32xf32>
    %228 = vector.extract_strided_slice %226 {offsets = [0, 0], sizes = [2, 32], strides = [1, 1]} : vector<2x128xf32> to vector<2x32xf32>
    %229 = tpu.concatenate %227, %228 in 1 : vector<2x32xf32>, vector<2x32xf32> -> vector<2x64xf32>
    %230 = arith.negf %229 : vector<2x64xf32>
    %231 = math.exp %230 : vector<2x64xf32>
    %cst_61 = arith.constant 1.000000e+00 : f32
    %232 = vector.broadcast %cst_61 : f32 to vector<2x64xf32>
    %233 = arith.addf %232, %231 : vector<2x64xf32>
    %234 = arith.divf %232, %233 : vector<2x64xf32>
    %235 = vector.extract_strided_slice %223 {offsets = [0, 32], sizes = [2, 32], strides = [1, 1]} : vector<2x128xf32> to vector<2x32xf32>
    %236 = vector.extract_strided_slice %226 {offsets = [0, 32], sizes = [2, 32], strides = [1, 1]} : vector<2x128xf32> to vector<2x32xf32>
    %237 = tpu.concatenate %235, %236 in 1 : vector<2x32xf32>, vector<2x32xf32> -> vector<2x64xf32>
    %238 = arith.negf %237 : vector<2x64xf32>
    %239 = math.exp %238 : vector<2x64xf32>
    %cst_62 = arith.constant 1.000000e+00 : f32
    %240 = vector.broadcast %cst_62 : f32 to vector<2x64xf32>
    %241 = arith.addf %240, %239 : vector<2x64xf32>
    %242 = arith.divf %240, %241 : vector<2x64xf32>
    %243 = vector.extract_strided_slice %223 {offsets = [0, 64], sizes = [2, 32], strides = [1, 1]} : vector<2x128xf32> to vector<2x32xf32>
    %244 = vector.extract_strided_slice %226 {offsets = [0, 64], sizes = [2, 32], strides = [1, 1]} : vector<2x128xf32> to vector<2x32xf32>
    %245 = tpu.concatenate %243, %244 in 1 : vector<2x32xf32>, vector<2x32xf32> -> vector<2x64xf32>
    %246 = math.tanh %245 : vector<2x64xf32>
    %247 = vector.extract_strided_slice %223 {offsets = [0, 96], sizes = [2, 32], strides = [1, 1]} : vector<2x128xf32> to vector<2x32xf32>
    %248 = vector.extract_strided_slice %226 {offsets = [0, 96], sizes = [2, 32], strides = [1, 1]} : vector<2x128xf32> to vector<2x32xf32>
    %249 = tpu.concatenate %247, %248 in 1 : vector<2x32xf32>, vector<2x32xf32> -> vector<2x64xf32>
    %250 = arith.negf %249 : vector<2x64xf32>
    %251 = math.exp %250 : vector<2x64xf32>
    %cst_63 = arith.constant 1.000000e+00 : f32
    %252 = vector.broadcast %cst_63 : f32 to vector<2x64xf32>
    %253 = arith.addf %252, %251 : vector<2x64xf32>
    %254 = arith.divf %252, %253 : vector<2x64xf32>
    %255 = arith.mulf %242, %213 : vector<2x64xf32>
    %256 = arith.mulf %234, %246 : vector<2x64xf32>
    %257 = arith.addf %255, %256 : vector<2x64xf32>
    %258 = math.tanh %257 : vector<2x64xf32>
    %259 = arith.mulf %254, %258 : vector<2x64xf32>
    %c4 = arith.constant 4 : index
    %c0_64 = arith.constant 0 : index
    %c0_65 = arith.constant 0 : index
    %260 = vector.load %arg1[%c4, %c0_64, %c0_65] : memref<8x2x64xf32, #tpu.memory_space<vmem>>, vector<1x2x64xf32>
    %261 = vector.shape_cast %260 : vector<1x2x64xf32> to vector<2x64xf32>
    %cst_66 = arith.constant 5.000000e-01 : f32
    %262 = vector.broadcast %cst_66 : f32 to vector<2x64xf32>
    %263 = arith.cmpf ogt, %261, %262 : vector<2x64xf32>
    %264 = arith.select %263, %257, %213 : vector<2x64xi1>, vector<2x64xf32>
    %265 = arith.select %263, %259, %214 : vector<2x64xi1>, vector<2x64xf32>
    %cst_67 = arith.constant 0.000000e+00 : f32
    %266 = vector.broadcast %cst_67 : f32 to vector<2x64xf32>
    %267 = arith.select %263, %259, %266 : vector<2x64xi1>, vector<2x64xf32>
    %c4_68 = arith.constant 4 : index
    %c0_69 = arith.constant 0 : index
    %c0_70 = arith.constant 0 : index
    %268 = vector.load %arg9[%c4_68, %c0_69, %c0_70] : memref<8x2x64xf32, #tpu.memory_space<vmem>>, vector<1x2x64xf32>
    %269 = vector.shape_cast %268 : vector<1x2x64xf32> to vector<2x64xf32>
    %270 = vector.shape_cast %267 : vector<2x64xf32> to vector<1x2x64xf32>
    tpu.vector_store %arg9[%c4_68, %c0_69, %c0_70], %270 {strides = array<i32>} : memref<8x2x64xf32, #tpu.memory_space<vmem>>, vector<1x2x64xf32>,
    %cst_71 = arith.constant dense<0.000000e+00> : vector<2x256xf32>
    %271 = tpu.matmul %265, %13, %cst_71 {dimension_numbers = #tpu.dot_dimension_numbers<[1], [0], [0], [1], [0, 0, 1, 1], [], []>} : vector<2x64xf32>, vector<64x256xf32>, vector<2x256xf32> -> vector<2x256xf32>
    %272 = vector.extract_strided_slice %271 {offsets = [0, 0], sizes = [2, 128], strides = [1, 1]} : vector<2x256xf32> to vector<2x128xf32>
    %273 = vector.extract_strided_slice %12 {offsets = [10, 0], sizes = [2, 128], strides = [1, 1]} : vector<16x256xf32> to vector<2x128xf32>
    %274 = arith.addf %272, %273 : vector<2x128xf32>
    %275 = vector.extract_strided_slice %271 {offsets = [0, 128], sizes = [2, 128], strides = [1, 1]} : vector<2x256xf32> to vector<2x128xf32>
    %276 = vector.extract_strided_slice %12 {offsets = [4, 128], sizes = [2, 128], strides = [1, 1]} : vector<16x256xf32> to vector<2x128xf32>
    %277 = arith.addf %275, %276 : vector<2x128xf32>
    %278 = vector.extract_strided_slice %274 {offsets = [0, 0], sizes = [2, 32], strides = [1, 1]} : vector<2x128xf32> to vector<2x32xf32>
    %279 = vector.extract_strided_slice %277 {offsets = [0, 0], sizes = [2, 32], strides = [1, 1]} : vector<2x128xf32> to vector<2x32xf32>
    %280 = tpu.concatenate %278, %279 in 1 : vector<2x32xf32>, vector<2x32xf32> -> vector<2x64xf32>
    %281 = arith.negf %280 : vector<2x64xf32>
    %282 = math.exp %281 : vector<2x64xf32>
    %cst_72 = arith.constant 1.000000e+00 : f32
    %283 = vector.broadcast %cst_72 : f32 to vector<2x64xf32>
    %284 = arith.addf %283, %282 : vector<2x64xf32>
    %285 = arith.divf %283, %284 : vector<2x64xf32>
    %286 = vector.extract_strided_slice %274 {offsets = [0, 32], sizes = [2, 32], strides = [1, 1]} : vector<2x128xf32> to vector<2x32xf32>
    %287 = vector.extract_strided_slice %277 {offsets = [0, 32], sizes = [2, 32], strides = [1, 1]} : vector<2x128xf32> to vector<2x32xf32>
    %288 = tpu.concatenate %286, %287 in 1 : vector<2x32xf32>, vector<2x32xf32> -> vector<2x64xf32>
    %289 = arith.negf %288 : vector<2x64xf32>
    %290 = math.exp %289 : vector<2x64xf32>
    %cst_73 = arith.constant 1.000000e+00 : f32
    %291 = vector.broadcast %cst_73 : f32 to vector<2x64xf32>
    %292 = arith.addf %291, %290 : vector<2x64xf32>
    %293 = arith.divf %291, %292 : vector<2x64xf32>
    %294 = vector.extract_strided_slice %274 {offsets = [0, 64], sizes = [2, 32], strides = [1, 1]} : vector<2x128xf32> to vector<2x32xf32>
    %295 = vector.extract_strided_slice %277 {offsets = [0, 64], sizes = [2, 32], strides = [1, 1]} : vector<2x128xf32> to vector<2x32xf32>
    %296 = tpu.concatenate %294, %295 in 1 : vector<2x32xf32>, vector<2x32xf32> -> vector<2x64xf32>
    %297 = math.tanh %296 : vector<2x64xf32>
    %298 = vector.extract_strided_slice %274 {offsets = [0, 96], sizes = [2, 32], strides = [1, 1]} : vector<2x128xf32> to vector<2x32xf32>
    %299 = vector.extract_strided_slice %277 {offsets = [0, 96], sizes = [2, 32], strides = [1, 1]} : vector<2x128xf32> to vector<2x32xf32>
    %300 = tpu.concatenate %298, %299 in 1 : vector<2x32xf32>, vector<2x32xf32> -> vector<2x64xf32>
    %301 = arith.negf %300 : vector<2x64xf32>
    %302 = math.exp %301 : vector<2x64xf32>
    %cst_74 = arith.constant 1.000000e+00 : f32
    %303 = vector.broadcast %cst_74 : f32 to vector<2x64xf32>
    %304 = arith.addf %303, %302 : vector<2x64xf32>
    %305 = arith.divf %303, %304 : vector<2x64xf32>
    %306 = arith.mulf %293, %264 : vector<2x64xf32>
    %307 = arith.mulf %285, %297 : vector<2x64xf32>
    %308 = arith.addf %306, %307 : vector<2x64xf32>
    %309 = math.tanh %308 : vector<2x64xf32>
    %310 = arith.mulf %305, %309 : vector<2x64xf32>
    %c5 = arith.constant 5 : index
    %c0_75 = arith.constant 0 : index
    %c0_76 = arith.constant 0 : index
    %311 = vector.load %arg1[%c5, %c0_75, %c0_76] : memref<8x2x64xf32, #tpu.memory_space<vmem>>, vector<1x2x64xf32>
    %312 = vector.shape_cast %311 : vector<1x2x64xf32> to vector<2x64xf32>
    %cst_77 = arith.constant 5.000000e-01 : f32
    %313 = vector.broadcast %cst_77 : f32 to vector<2x64xf32>
    %314 = arith.cmpf ogt, %312, %313 : vector<2x64xf32>
    %315 = arith.select %314, %308, %264 : vector<2x64xi1>, vector<2x64xf32>
    %316 = arith.select %314, %310, %265 : vector<2x64xi1>, vector<2x64xf32>
    %cst_78 = arith.constant 0.000000e+00 : f32
    %317 = vector.broadcast %cst_78 : f32 to vector<2x64xf32>
    %318 = arith.select %314, %310, %317 : vector<2x64xi1>, vector<2x64xf32>
    %c5_79 = arith.constant 5 : index
    %c0_80 = arith.constant 0 : index
    %c0_81 = arith.constant 0 : index
    %319 = vector.load %arg9[%c5_79, %c0_80, %c0_81] : memref<8x2x64xf32, #tpu.memory_space<vmem>>, vector<1x2x64xf32>
    %320 = vector.shape_cast %319 : vector<1x2x64xf32> to vector<2x64xf32>
    %321 = vector.shape_cast %318 : vector<2x64xf32> to vector<1x2x64xf32>
    tpu.vector_store %arg9[%c5_79, %c0_80, %c0_81], %321 {strides = array<i32>} : memref<8x2x64xf32, #tpu.memory_space<vmem>>, vector<1x2x64xf32>,
    %cst_82 = arith.constant dense<0.000000e+00> : vector<2x256xf32>
    %322 = tpu.matmul %316, %13, %cst_82 {dimension_numbers = #tpu.dot_dimension_numbers<[1], [0], [0], [1], [0, 0, 1, 1], [], []>} : vector<2x64xf32>, vector<64x256xf32>, vector<2x256xf32> -> vector<2x256xf32>
    %323 = vector.extract_strided_slice %322 {offsets = [0, 0], sizes = [2, 128], strides = [1, 1]} : vector<2x256xf32> to vector<2x128xf32>
    %324 = vector.extract_strided_slice %12 {offsets = [12, 0], sizes = [2, 128], strides = [1, 1]} : vector<16x256xf32> to vector<2x128xf32>
    %325 = arith.addf %323, %324 : vector<2x128xf32>
    %326 = vector.extract_strided_slice %322 {offsets = [0, 128], sizes = [2, 128], strides = [1, 1]} : vector<2x256xf32> to vector<2x128xf32>
    %327 = vector.extract_strided_slice %12 {offsets = [2, 128], sizes = [2, 128], strides = [1, 1]} : vector<16x256xf32> to vector<2x128xf32>
    %328 = arith.addf %326, %327 : vector<2x128xf32>
    %329 = vector.extract_strided_slice %325 {offsets = [0, 0], sizes = [2, 32], strides = [1, 1]} : vector<2x128xf32> to vector<2x32xf32>
    %330 = vector.extract_strided_slice %328 {offsets = [0, 0], sizes = [2, 32], strides = [1, 1]} : vector<2x128xf32> to vector<2x32xf32>
    %331 = tpu.concatenate %329, %330 in 1 : vector<2x32xf32>, vector<2x32xf32> -> vector<2x64xf32>
    %332 = arith.negf %331 : vector<2x64xf32>
    %333 = math.exp %332 : vector<2x64xf32>
    %cst_83 = arith.constant 1.000000e+00 : f32
    %334 = vector.broadcast %cst_83 : f32 to vector<2x64xf32>
    %335 = arith.addf %334, %333 : vector<2x64xf32>
    %336 = arith.divf %334, %335 : vector<2x64xf32>
    %337 = vector.extract_strided_slice %325 {offsets = [0, 32], sizes = [2, 32], strides = [1, 1]} : vector<2x128xf32> to vector<2x32xf32>
    %338 = vector.extract_strided_slice %328 {offsets = [0, 32], sizes = [2, 32], strides = [1, 1]} : vector<2x128xf32> to vector<2x32xf32>
    %339 = tpu.concatenate %337, %338 in 1 : vector<2x32xf32>, vector<2x32xf32> -> vector<2x64xf32>
    %340 = arith.negf %339 : vector<2x64xf32>
    %341 = math.exp %340 : vector<2x64xf32>
    %cst_84 = arith.constant 1.000000e+00 : f32
    %342 = vector.broadcast %cst_84 : f32 to vector<2x64xf32>
    %343 = arith.addf %342, %341 : vector<2x64xf32>
    %344 = arith.divf %342, %343 : vector<2x64xf32>
    %345 = vector.extract_strided_slice %325 {offsets = [0, 64], sizes = [2, 32], strides = [1, 1]} : vector<2x128xf32> to vector<2x32xf32>
    %346 = vector.extract_strided_slice %328 {offsets = [0, 64], sizes = [2, 32], strides = [1, 1]} : vector<2x128xf32> to vector<2x32xf32>
    %347 = tpu.concatenate %345, %346 in 1 : vector<2x32xf32>, vector<2x32xf32> -> vector<2x64xf32>
    %348 = math.tanh %347 : vector<2x64xf32>
    %349 = vector.extract_strided_slice %325 {offsets = [0, 96], sizes = [2, 32], strides = [1, 1]} : vector<2x128xf32> to vector<2x32xf32>
    %350 = vector.extract_strided_slice %328 {offsets = [0, 96], sizes = [2, 32], strides = [1, 1]} : vector<2x128xf32> to vector<2x32xf32>
    %351 = tpu.concatenate %349, %350 in 1 : vector<2x32xf32>, vector<2x32xf32> -> vector<2x64xf32>
    %352 = arith.negf %351 : vector<2x64xf32>
    %353 = math.exp %352 : vector<2x64xf32>
    %cst_85 = arith.constant 1.000000e+00 : f32
    %354 = vector.broadcast %cst_85 : f32 to vector<2x64xf32>
    %355 = arith.addf %354, %353 : vector<2x64xf32>
    %356 = arith.divf %354, %355 : vector<2x64xf32>
    %357 = arith.mulf %344, %315 : vector<2x64xf32>
    %358 = arith.mulf %336, %348 : vector<2x64xf32>
    %359 = arith.addf %357, %358 : vector<2x64xf32>
    %360 = math.tanh %359 : vector<2x64xf32>
    %361 = arith.mulf %356, %360 : vector<2x64xf32>
    %c6 = arith.constant 6 : index
    %c0_86 = arith.constant 0 : index
    %c0_87 = arith.constant 0 : index
    %362 = vector.load %arg1[%c6, %c0_86, %c0_87] : memref<8x2x64xf32, #tpu.memory_space<vmem>>, vector<1x2x64xf32>
    %363 = vector.shape_cast %362 : vector<1x2x64xf32> to vector<2x64xf32>
    %cst_88 = arith.constant 5.000000e-01 : f32
    %364 = vector.broadcast %cst_88 : f32 to vector<2x64xf32>
    %365 = arith.cmpf ogt, %363, %364 : vector<2x64xf32>
    %366 = arith.select %365, %359, %315 : vector<2x64xi1>, vector<2x64xf32>
    %367 = arith.select %365, %361, %316 : vector<2x64xi1>, vector<2x64xf32>
    %cst_89 = arith.constant 0.000000e+00 : f32
    %368 = vector.broadcast %cst_89 : f32 to vector<2x64xf32>
    %369 = arith.select %365, %361, %368 : vector<2x64xi1>, vector<2x64xf32>
    %c6_90 = arith.constant 6 : index
    %c0_91 = arith.constant 0 : index
    %c0_92 = arith.constant 0 : index
    %370 = vector.load %arg9[%c6_90, %c0_91, %c0_92] : memref<8x2x64xf32, #tpu.memory_space<vmem>>, vector<1x2x64xf32>
    %371 = vector.shape_cast %370 : vector<1x2x64xf32> to vector<2x64xf32>
    %372 = vector.shape_cast %369 : vector<2x64xf32> to vector<1x2x64xf32>
    tpu.vector_store %arg9[%c6_90, %c0_91, %c0_92], %372 {strides = array<i32>} : memref<8x2x64xf32, #tpu.memory_space<vmem>>, vector<1x2x64xf32>,
    %cst_93 = arith.constant dense<0.000000e+00> : vector<2x256xf32>
    %373 = tpu.matmul %367, %13, %cst_93 {dimension_numbers = #tpu.dot_dimension_numbers<[1], [0], [0], [1], [0, 0, 1, 1], [], []>} : vector<2x64xf32>, vector<64x256xf32>, vector<2x256xf32> -> vector<2x256xf32>
    %374 = vector.extract_strided_slice %373 {offsets = [0, 0], sizes = [2, 128], strides = [1, 1]} : vector<2x256xf32> to vector<2x128xf32>
    %375 = vector.extract_strided_slice %12 {offsets = [14, 0], sizes = [2, 128], strides = [1, 1]} : vector<16x256xf32> to vector<2x128xf32>
    %376 = arith.addf %374, %375 : vector<2x128xf32>
    %377 = vector.extract_strided_slice %373 {offsets = [0, 128], sizes = [2, 128], strides = [1, 1]} : vector<2x256xf32> to vector<2x128xf32>
    %378 = vector.extract_strided_slice %12 {offsets = [0, 128], sizes = [2, 128], strides = [1, 1]} : vector<16x256xf32> to vector<2x128xf32>
    %379 = arith.addf %377, %378 : vector<2x128xf32>
    %380 = vector.extract_strided_slice %376 {offsets = [0, 0], sizes = [2, 32], strides = [1, 1]} : vector<2x128xf32> to vector<2x32xf32>
    %381 = vector.extract_strided_slice %379 {offsets = [0, 0], sizes = [2, 32], strides = [1, 1]} : vector<2x128xf32> to vector<2x32xf32>
    %382 = tpu.concatenate %380, %381 in 1 : vector<2x32xf32>, vector<2x32xf32> -> vector<2x64xf32>
    %383 = arith.negf %382 : vector<2x64xf32>
    %384 = math.exp %383 : vector<2x64xf32>
    %cst_94 = arith.constant 1.000000e+00 : f32
    %385 = vector.broadcast %cst_94 : f32 to vector<2x64xf32>
    %386 = arith.addf %385, %384 : vector<2x64xf32>
    %387 = arith.divf %385, %386 : vector<2x64xf32>
    %388 = vector.extract_strided_slice %376 {offsets = [0, 32], sizes = [2, 32], strides = [1, 1]} : vector<2x128xf32> to vector<2x32xf32>
    %389 = vector.extract_strided_slice %379 {offsets = [0, 32], sizes = [2, 32], strides = [1, 1]} : vector<2x128xf32> to vector<2x32xf32>
    %390 = tpu.concatenate %388, %389 in 1 : vector<2x32xf32>, vector<2x32xf32> -> vector<2x64xf32>
    %391 = arith.negf %390 : vector<2x64xf32>
    %392 = math.exp %391 : vector<2x64xf32>
    %cst_95 = arith.constant 1.000000e+00 : f32
    %393 = vector.broadcast %cst_95 : f32 to vector<2x64xf32>
    %394 = arith.addf %393, %392 : vector<2x64xf32>
    %395 = arith.divf %393, %394 : vector<2x64xf32>
    %396 = vector.extract_strided_slice %376 {offsets = [0, 64], sizes = [2, 32], strides = [1, 1]} : vector<2x128xf32> to vector<2x32xf32>
    %397 = vector.extract_strided_slice %379 {offsets = [0, 64], sizes = [2, 32], strides = [1, 1]} : vector<2x128xf32> to vector<2x32xf32>
    %398 = tpu.concatenate %396, %397 in 1 : vector<2x32xf32>, vector<2x32xf32> -> vector<2x64xf32>
    %399 = math.tanh %398 : vector<2x64xf32>
    %400 = vector.extract_strided_slice %376 {offsets = [0, 96], sizes = [2, 32], strides = [1, 1]} : vector<2x128xf32> to vector<2x32xf32>
    %401 = vector.extract_strided_slice %379 {offsets = [0, 96], sizes = [2, 32], strides = [1, 1]} : vector<2x128xf32> to vector<2x32xf32>
    %402 = tpu.concatenate %400, %401 in 1 : vector<2x32xf32>, vector<2x32xf32> -> vector<2x64xf32>
    %403 = arith.negf %402 : vector<2x64xf32>
    %404 = math.exp %403 : vector<2x64xf32>
    %cst_96 = arith.constant 1.000000e+00 : f32
    %405 = vector.broadcast %cst_96 : f32 to vector<2x64xf32>
    %406 = arith.addf %405, %404 : vector<2x64xf32>
    %407 = arith.divf %405, %406 : vector<2x64xf32>
    %408 = arith.mulf %395, %366 : vector<2x64xf32>
    %409 = arith.mulf %387, %399 : vector<2x64xf32>
    %410 = arith.addf %408, %409 : vector<2x64xf32>
    %411 = math.tanh %410 : vector<2x64xf32>
    %412 = arith.mulf %407, %411 : vector<2x64xf32>
    %c7 = arith.constant 7 : index
    %c0_97 = arith.constant 0 : index
    %c0_98 = arith.constant 0 : index
    %413 = vector.load %arg1[%c7, %c0_97, %c0_98] : memref<8x2x64xf32, #tpu.memory_space<vmem>>, vector<1x2x64xf32>
    %414 = vector.shape_cast %413 : vector<1x2x64xf32> to vector<2x64xf32>
    %cst_99 = arith.constant 5.000000e-01 : f32
    %415 = vector.broadcast %cst_99 : f32 to vector<2x64xf32>
    %416 = arith.cmpf ogt, %414, %415 : vector<2x64xf32>
    %417 = arith.select %416, %412, %367 : vector<2x64xi1>, vector<2x64xf32>
    %cst_100 = arith.constant 0.000000e+00 : f32
    %418 = vector.broadcast %cst_100 : f32 to vector<2x64xf32>
    %419 = arith.select %416, %412, %418 : vector<2x64xi1>, vector<2x64xf32>
    %c7_101 = arith.constant 7 : index
    %c0_102 = arith.constant 0 : index
    %c0_103 = arith.constant 0 : index
    %420 = vector.load %arg9[%c7_101, %c0_102, %c0_103] : memref<8x2x64xf32, #tpu.memory_space<vmem>>, vector<1x2x64xf32>
    %421 = vector.shape_cast %420 : vector<1x2x64xf32> to vector<2x64xf32>
    %422 = vector.shape_cast %419 : vector<2x64xf32> to vector<1x2x64xf32>
    tpu.vector_store %arg9[%c7_101, %c0_102, %c0_103], %422 {strides = array<i32>} : memref<8x2x64xf32, #tpu.memory_space<vmem>>, vector<1x2x64xf32>,
    %c0_104 = arith.constant 0 : index
    %c0_105 = arith.constant 0 : index
    %423 = vector.load %arg8[%c0_104, %c0_105] : memref<2x64xf32, #tpu.memory_space<vmem>>, vector<2x64xf32>
    tpu.vector_store %arg8[%c0_104, %c0_105], %417 {strides = array<i32>} : memref<2x64xf32, #tpu.memory_space<vmem>>, vector<2x64xf32>,
    %c0_106 = arith.constant 0 : index
    %c0_107 = arith.constant 0 : index
    %c0_108 = arith.constant 0 : index
    %424 = vector.load %arg9[%c0_106, %c0_107, %c0_108] : memref<8x2x64xf32, #tpu.memory_space<vmem>>, vector<1x2x64xf32>
    %425 = vector.shape_cast %424 : vector<1x2x64xf32> to vector<2x64xf32>
    %c7_109 = arith.constant 7 : index
    %c0_110 = arith.constant 0 : index
    %c0_111 = arith.constant 0 : index
    %426 = vector.load %arg9[%c7_109, %c0_110, %c0_111] : memref<8x2x64xf32, #tpu.memory_space<vmem>>, vector<1x2x64xf32>
    %427 = vector.shape_cast %426 : vector<1x2x64xf32> to vector<2x64xf32>
    %428 = vector.extract_strided_slice %425 {offsets = [0, 0], sizes = [2, 32], strides = [1, 1]} : vector<2x64xf32> to vector<2x32xf32>
    %429 = vector.extract_strided_slice %427 {offsets = [0, 32], sizes = [2, 32], strides = [1, 1]} : vector<2x64xf32> to vector<2x32xf32>
    %430 = tpu.concatenate %428, %429 in 1 : vector<2x32xf32>, vector<2x32xf32> -> vector<2x64xf32>
    %cst_112 = arith.constant dense<0.000000e+00> : vector<2xf32>
    %431 = vector.multi_reduction <add>, %430, %cst_112 [1] : vector<2x64xf32> to vector<2xf32>
    %432 = vector.shape_cast %431 : vector<2xf32> to vector<2x1xf32>
    %cst_113 = arith.constant 1.562500e-02 : f32
    %433 = vector.broadcast %cst_113 : f32 to vector<2x1xf32>
    %434 = arith.mulf %432, %433 : vector<2x1xf32>
    %435 = vector.broadcast %434 : vector<2x1xf32> to vector<2x64xf32>
    %436 = arith.subf %430, %435 : vector<2x64xf32>
    %437 = arith.mulf %436, %436 : vector<2x64xf32>
    %cst_114 = arith.constant dense<0.000000e+00> : vector<2xf32>
    %438 = vector.multi_reduction <add>, %437, %cst_114 [1] : vector<2x64xf32> to vector<2xf32>
    %439 = vector.shape_cast %438 : vector<2xf32> to vector<2x1xf32>
    %cst_115 = arith.constant 1.562500e-02 : f32
    %440 = vector.broadcast %cst_115 : f32 to vector<2x1xf32>
    %441 = arith.mulf %439, %440 : vector<2x1xf32>
    %cst_116 = arith.constant 9.99999974E-6 : f32
    %442 = vector.broadcast %cst_116 : f32 to vector<2x1xf32>
    %443 = arith.addf %441, %442 : vector<2x1xf32>
    %444 = math.rsqrt %443 : vector<2x1xf32>
    %445 = vector.broadcast %444 : vector<2x1xf32> to vector<2x64xf32>
    %446 = arith.mulf %436, %445 : vector<2x64xf32>
    %c0_117 = arith.constant 0 : index
    %c0_118 = arith.constant 0 : index
    %c0_119 = arith.constant 0 : index
    %447 = vector.load %arg7[%c0_117, %c0_118, %c0_119] : memref<8x2x64xf32, #tpu.memory_space<vmem>>, vector<1x2x64xf32>
    %448 = vector.shape_cast %447 : vector<1x2x64xf32> to vector<2x64xf32>
    %449 = vector.shape_cast %446 : vector<2x64xf32> to vector<1x2x64xf32>
    tpu.vector_store %arg7[%c0_117, %c0_118, %c0_119], %449 {strides = array<i32>} : memref<8x2x64xf32, #tpu.memory_space<vmem>>, vector<1x2x64xf32>,
    %c1_120 = arith.constant 1 : index
    %c0_121 = arith.constant 0 : index
    %c0_122 = arith.constant 0 : index
    %450 = vector.load %arg9[%c1_120, %c0_121, %c0_122] : memref<8x2x64xf32, #tpu.memory_space<vmem>>, vector<1x2x64xf32>
    %451 = vector.shape_cast %450 : vector<1x2x64xf32> to vector<2x64xf32>
    %c6_123 = arith.constant 6 : index
    %c0_124 = arith.constant 0 : index
    %c0_125 = arith.constant 0 : index
    %452 = vector.load %arg9[%c6_123, %c0_124, %c0_125] : memref<8x2x64xf32, #tpu.memory_space<vmem>>, vector<1x2x64xf32>
    %453 = vector.shape_cast %452 : vector<1x2x64xf32> to vector<2x64xf32>
    %454 = vector.extract_strided_slice %451 {offsets = [0, 0], sizes = [2, 32], strides = [1, 1]} : vector<2x64xf32> to vector<2x32xf32>
    %455 = vector.extract_strided_slice %453 {offsets = [0, 32], sizes = [2, 32], strides = [1, 1]} : vector<2x64xf32> to vector<2x32xf32>
    %456 = tpu.concatenate %454, %455 in 1 : vector<2x32xf32>, vector<2x32xf32> -> vector<2x64xf32>
    %cst_126 = arith.constant dense<0.000000e+00> : vector<2xf32>
    %457 = vector.multi_reduction <add>, %456, %cst_126 [1] : vector<2x64xf32> to vector<2xf32>
    %458 = vector.shape_cast %457 : vector<2xf32> to vector<2x1xf32>
    %cst_127 = arith.constant 1.562500e-02 : f32
    %459 = vector.broadcast %cst_127 : f32 to vector<2x1xf32>
    %460 = arith.mulf %458, %459 : vector<2x1xf32>
    %461 = vector.broadcast %460 : vector<2x1xf32> to vector<2x64xf32>
    %462 = arith.subf %456, %461 : vector<2x64xf32>
    %463 = arith.mulf %462, %462 : vector<2x64xf32>
    %cst_128 = arith.constant dense<0.000000e+00> : vector<2xf32>
    %464 = vector.multi_reduction <add>, %463, %cst_128 [1] : vector<2x64xf32> to vector<2xf32>
    %465 = vector.shape_cast %464 : vector<2xf32> to vector<2x1xf32>
    %cst_129 = arith.constant 1.562500e-02 : f32
    %466 = vector.broadcast %cst_129 : f32 to vector<2x1xf32>
    %467 = arith.mulf %465, %466 : vector<2x1xf32>
    %cst_130 = arith.constant 9.99999974E-6 : f32
    %468 = vector.broadcast %cst_130 : f32 to vector<2x1xf32>
    %469 = arith.addf %467, %468 : vector<2x1xf32>
    %470 = math.rsqrt %469 : vector<2x1xf32>
    %471 = vector.broadcast %470 : vector<2x1xf32> to vector<2x64xf32>
    %472 = arith.mulf %462, %471 : vector<2x64xf32>
    %c1_131 = arith.constant 1 : index
    %c0_132 = arith.constant 0 : index
    %c0_133 = arith.constant 0 : index
    %473 = vector.load %arg7[%c1_131, %c0_132, %c0_133] : memref<8x2x64xf32, #tpu.memory_space<vmem>>, vector<1x2x64xf32>
    %474 = vector.shape_cast %473 : vector<1x2x64xf32> to vector<2x64xf32>
    %475 = vector.shape_cast %472 : vector<2x64xf32> to vector<1x2x64xf32>
    tpu.vector_store %arg7[%c1_131, %c0_132, %c0_133], %475 {strides = array<i32>} : memref<8x2x64xf32, #tpu.memory_space<vmem>>, vector<1x2x64xf32>,
    %c2_134 = arith.constant 2 : index
    %c0_135 = arith.constant 0 : index
    %c0_136 = arith.constant 0 : index
    %476 = vector.load %arg9[%c2_134, %c0_135, %c0_136] : memref<8x2x64xf32, #tpu.memory_space<vmem>>, vector<1x2x64xf32>
    %477 = vector.shape_cast %476 : vector<1x2x64xf32> to vector<2x64xf32>
    %c5_137 = arith.constant 5 : index
    %c0_138 = arith.constant 0 : index
    %c0_139 = arith.constant 0 : index
    %478 = vector.load %arg9[%c5_137, %c0_138, %c0_139] : memref<8x2x64xf32, #tpu.memory_space<vmem>>, vector<1x2x64xf32>
    %479 = vector.shape_cast %478 : vector<1x2x64xf32> to vector<2x64xf32>
    %480 = vector.extract_strided_slice %477 {offsets = [0, 0], sizes = [2, 32], strides = [1, 1]} : vector<2x64xf32> to vector<2x32xf32>
    %481 = vector.extract_strided_slice %479 {offsets = [0, 32], sizes = [2, 32], strides = [1, 1]} : vector<2x64xf32> to vector<2x32xf32>
    %482 = tpu.concatenate %480, %481 in 1 : vector<2x32xf32>, vector<2x32xf32> -> vector<2x64xf32>
    %cst_140 = arith.constant dense<0.000000e+00> : vector<2xf32>
    %483 = vector.multi_reduction <add>, %482, %cst_140 [1] : vector<2x64xf32> to vector<2xf32>
    %484 = vector.shape_cast %483 : vector<2xf32> to vector<2x1xf32>
    %cst_141 = arith.constant 1.562500e-02 : f32
    %485 = vector.broadcast %cst_141 : f32 to vector<2x1xf32>
    %486 = arith.mulf %484, %485 : vector<2x1xf32>
    %487 = vector.broadcast %486 : vector<2x1xf32> to vector<2x64xf32>
    %488 = arith.subf %482, %487 : vector<2x64xf32>
    %489 = arith.mulf %488, %488 : vector<2x64xf32>
    %cst_142 = arith.constant dense<0.000000e+00> : vector<2xf32>
    %490 = vector.multi_reduction <add>, %489, %cst_142 [1] : vector<2x64xf32> to vector<2xf32>
    %491 = vector.shape_cast %490 : vector<2xf32> to vector<2x1xf32>
    %cst_143 = arith.constant 1.562500e-02 : f32
    %492 = vector.broadcast %cst_143 : f32 to vector<2x1xf32>
    %493 = arith.mulf %491, %492 : vector<2x1xf32>
    %cst_144 = arith.constant 9.99999974E-6 : f32
    %494 = vector.broadcast %cst_144 : f32 to vector<2x1xf32>
    %495 = arith.addf %493, %494 : vector<2x1xf32>
    %496 = math.rsqrt %495 : vector<2x1xf32>
    %497 = vector.broadcast %496 : vector<2x1xf32> to vector<2x64xf32>
    %498 = arith.mulf %488, %497 : vector<2x64xf32>
    %c2_145 = arith.constant 2 : index
    %c0_146 = arith.constant 0 : index
    %c0_147 = arith.constant 0 : index
    %499 = vector.load %arg7[%c2_145, %c0_146, %c0_147] : memref<8x2x64xf32, #tpu.memory_space<vmem>>, vector<1x2x64xf32>
    %500 = vector.shape_cast %499 : vector<1x2x64xf32> to vector<2x64xf32>
    %501 = vector.shape_cast %498 : vector<2x64xf32> to vector<1x2x64xf32>
    tpu.vector_store %arg7[%c2_145, %c0_146, %c0_147], %501 {strides = array<i32>} : memref<8x2x64xf32, #tpu.memory_space<vmem>>, vector<1x2x64xf32>,
    %c3_148 = arith.constant 3 : index
    %c0_149 = arith.constant 0 : index
    %c0_150 = arith.constant 0 : index
    %502 = vector.load %arg9[%c3_148, %c0_149, %c0_150] : memref<8x2x64xf32, #tpu.memory_space<vmem>>, vector<1x2x64xf32>
    %503 = vector.shape_cast %502 : vector<1x2x64xf32> to vector<2x64xf32>
    %c4_151 = arith.constant 4 : index
    %c0_152 = arith.constant 0 : index
    %c0_153 = arith.constant 0 : index
    %504 = vector.load %arg9[%c4_151, %c0_152, %c0_153] : memref<8x2x64xf32, #tpu.memory_space<vmem>>, vector<1x2x64xf32>
    %505 = vector.shape_cast %504 : vector<1x2x64xf32> to vector<2x64xf32>
    %506 = vector.extract_strided_slice %503 {offsets = [0, 0], sizes = [2, 32], strides = [1, 1]} : vector<2x64xf32> to vector<2x32xf32>
    %507 = vector.extract_strided_slice %505 {offsets = [0, 32], sizes = [2, 32], strides = [1, 1]} : vector<2x64xf32> to vector<2x32xf32>
    %508 = tpu.concatenate %506, %507 in 1 : vector<2x32xf32>, vector<2x32xf32> -> vector<2x64xf32>
    %cst_154 = arith.constant dense<0.000000e+00> : vector<2xf32>
    %509 = vector.multi_reduction <add>, %508, %cst_154 [1] : vector<2x64xf32> to vector<2xf32>
    %510 = vector.shape_cast %509 : vector<2xf32> to vector<2x1xf32>
    %cst_155 = arith.constant 1.562500e-02 : f32
    %511 = vector.broadcast %cst_155 : f32 to vector<2x1xf32>
    %512 = arith.mulf %510, %511 : vector<2x1xf32>
    %513 = vector.broadcast %512 : vector<2x1xf32> to vector<2x64xf32>
    %514 = arith.subf %508, %513 : vector<2x64xf32>
    %515 = arith.mulf %514, %514 : vector<2x64xf32>
    %cst_156 = arith.constant dense<0.000000e+00> : vector<2xf32>
    %516 = vector.multi_reduction <add>, %515, %cst_156 [1] : vector<2x64xf32> to vector<2xf32>
    %517 = vector.shape_cast %516 : vector<2xf32> to vector<2x1xf32>
    %cst_157 = arith.constant 1.562500e-02 : f32
    %518 = vector.broadcast %cst_157 : f32 to vector<2x1xf32>
    %519 = arith.mulf %517, %518 : vector<2x1xf32>
    %cst_158 = arith.constant 9.99999974E-6 : f32
    %520 = vector.broadcast %cst_158 : f32 to vector<2x1xf32>
    %521 = arith.addf %519, %520 : vector<2x1xf32>
    %522 = math.rsqrt %521 : vector<2x1xf32>
    %523 = vector.broadcast %522 : vector<2x1xf32> to vector<2x64xf32>
    %524 = arith.mulf %514, %523 : vector<2x64xf32>
    %c3_159 = arith.constant 3 : index
    %c0_160 = arith.constant 0 : index
    %c0_161 = arith.constant 0 : index
    %525 = vector.load %arg7[%c3_159, %c0_160, %c0_161] : memref<8x2x64xf32, #tpu.memory_space<vmem>>, vector<1x2x64xf32>
    %526 = vector.shape_cast %525 : vector<1x2x64xf32> to vector<2x64xf32>
    %527 = vector.shape_cast %524 : vector<2x64xf32> to vector<1x2x64xf32>
    tpu.vector_store %arg7[%c3_159, %c0_160, %c0_161], %527 {strides = array<i32>} : memref<8x2x64xf32, #tpu.memory_space<vmem>>, vector<1x2x64xf32>,
    %c4_162 = arith.constant 4 : index
    %c0_163 = arith.constant 0 : index
    %c0_164 = arith.constant 0 : index
    %528 = vector.load %arg9[%c4_162, %c0_163, %c0_164] : memref<8x2x64xf32, #tpu.memory_space<vmem>>, vector<1x2x64xf32>
    %529 = vector.shape_cast %528 : vector<1x2x64xf32> to vector<2x64xf32>
    %c3_165 = arith.constant 3 : index
    %c0_166 = arith.constant 0 : index
    %c0_167 = arith.constant 0 : index
    %530 = vector.load %arg9[%c3_165, %c0_166, %c0_167] : memref<8x2x64xf32, #tpu.memory_space<vmem>>, vector<1x2x64xf32>
    %531 = vector.shape_cast %530 : vector<1x2x64xf32> to vector<2x64xf32>
    %532 = vector.extract_strided_slice %529 {offsets = [0, 0], sizes = [2, 32], strides = [1, 1]} : vector<2x64xf32> to vector<2x32xf32>
    %533 = vector.extract_strided_slice %531 {offsets = [0, 32], sizes = [2, 32], strides = [1, 1]} : vector<2x64xf32> to vector<2x32xf32>
    %534 = tpu.concatenate %532, %533 in 1 : vector<2x32xf32>, vector<2x32xf32> -> vector<2x64xf32>
    %cst_168 = arith.constant dense<0.000000e+00> : vector<2xf32>
    %535 = vector.multi_reduction <add>, %534, %cst_168 [1] : vector<2x64xf32> to vector<2xf32>
    %536 = vector.shape_cast %535 : vector<2xf32> to vector<2x1xf32>
    %cst_169 = arith.constant 1.562500e-02 : f32
    %537 = vector.broadcast %cst_169 : f32 to vector<2x1xf32>
    %538 = arith.mulf %536, %537 : vector<2x1xf32>
    %539 = vector.broadcast %538 : vector<2x1xf32> to vector<2x64xf32>
    %540 = arith.subf %534, %539 : vector<2x64xf32>
    %541 = arith.mulf %540, %540 : vector<2x64xf32>
    %cst_170 = arith.constant dense<0.000000e+00> : vector<2xf32>
    %542 = vector.multi_reduction <add>, %541, %cst_170 [1] : vector<2x64xf32> to vector<2xf32>
    %543 = vector.shape_cast %542 : vector<2xf32> to vector<2x1xf32>
    %cst_171 = arith.constant 1.562500e-02 : f32
    %544 = vector.broadcast %cst_171 : f32 to vector<2x1xf32>
    %545 = arith.mulf %543, %544 : vector<2x1xf32>
    %cst_172 = arith.constant 9.99999974E-6 : f32
    %546 = vector.broadcast %cst_172 : f32 to vector<2x1xf32>
    %547 = arith.addf %545, %546 : vector<2x1xf32>
    %548 = math.rsqrt %547 : vector<2x1xf32>
    %549 = vector.broadcast %548 : vector<2x1xf32> to vector<2x64xf32>
    %550 = arith.mulf %540, %549 : vector<2x64xf32>
    %c4_173 = arith.constant 4 : index
    %c0_174 = arith.constant 0 : index
    %c0_175 = arith.constant 0 : index
    %551 = vector.load %arg7[%c4_173, %c0_174, %c0_175] : memref<8x2x64xf32, #tpu.memory_space<vmem>>, vector<1x2x64xf32>
    %552 = vector.shape_cast %551 : vector<1x2x64xf32> to vector<2x64xf32>
    %553 = vector.shape_cast %550 : vector<2x64xf32> to vector<1x2x64xf32>
    tpu.vector_store %arg7[%c4_173, %c0_174, %c0_175], %553 {strides = array<i32>} : memref<8x2x64xf32, #tpu.memory_space<vmem>>, vector<1x2x64xf32>,
    %c5_176 = arith.constant 5 : index
    %c0_177 = arith.constant 0 : index
    %c0_178 = arith.constant 0 : index
    %554 = vector.load %arg9[%c5_176, %c0_177, %c0_178] : memref<8x2x64xf32, #tpu.memory_space<vmem>>, vector<1x2x64xf32>
    %555 = vector.shape_cast %554 : vector<1x2x64xf32> to vector<2x64xf32>
    %c2_179 = arith.constant 2 : index
    %c0_180 = arith.constant 0 : index
    %c0_181 = arith.constant 0 : index
    %556 = vector.load %arg9[%c2_179, %c0_180, %c0_181] : memref<8x2x64xf32, #tpu.memory_space<vmem>>, vector<1x2x64xf32>
    %557 = vector.shape_cast %556 : vector<1x2x64xf32> to vector<2x64xf32>
    %558 = vector.extract_strided_slice %555 {offsets = [0, 0], sizes = [2, 32], strides = [1, 1]} : vector<2x64xf32> to vector<2x32xf32>
    %559 = vector.extract_strided_slice %557 {offsets = [0, 32], sizes = [2, 32], strides = [1, 1]} : vector<2x64xf32> to vector<2x32xf32>
    %560 = tpu.concatenate %558, %559 in 1 : vector<2x32xf32>, vector<2x32xf32> -> vector<2x64xf32>
    %cst_182 = arith.constant dense<0.000000e+00> : vector<2xf32>
    %561 = vector.multi_reduction <add>, %560, %cst_182 [1] : vector<2x64xf32> to vector<2xf32>
    %562 = vector.shape_cast %561 : vector<2xf32> to vector<2x1xf32>
    %cst_183 = arith.constant 1.562500e-02 : f32
    %563 = vector.broadcast %cst_183 : f32 to vector<2x1xf32>
    %564 = arith.mulf %562, %563 : vector<2x1xf32>
    %565 = vector.broadcast %564 : vector<2x1xf32> to vector<2x64xf32>
    %566 = arith.subf %560, %565 : vector<2x64xf32>
    %567 = arith.mulf %566, %566 : vector<2x64xf32>
    %cst_184 = arith.constant dense<0.000000e+00> : vector<2xf32>
    %568 = vector.multi_reduction <add>, %567, %cst_184 [1] : vector<2x64xf32> to vector<2xf32>
    %569 = vector.shape_cast %568 : vector<2xf32> to vector<2x1xf32>
    %cst_185 = arith.constant 1.562500e-02 : f32
    %570 = vector.broadcast %cst_185 : f32 to vector<2x1xf32>
    %571 = arith.mulf %569, %570 : vector<2x1xf32>
    %cst_186 = arith.constant 9.99999974E-6 : f32
    %572 = vector.broadcast %cst_186 : f32 to vector<2x1xf32>
    %573 = arith.addf %571, %572 : vector<2x1xf32>
    %574 = math.rsqrt %573 : vector<2x1xf32>
    %575 = vector.broadcast %574 : vector<2x1xf32> to vector<2x64xf32>
    %576 = arith.mulf %566, %575 : vector<2x64xf32>
    %c5_187 = arith.constant 5 : index
    %c0_188 = arith.constant 0 : index
    %c0_189 = arith.constant 0 : index
    %577 = vector.load %arg7[%c5_187, %c0_188, %c0_189] : memref<8x2x64xf32, #tpu.memory_space<vmem>>, vector<1x2x64xf32>
    %578 = vector.shape_cast %577 : vector<1x2x64xf32> to vector<2x64xf32>
    %579 = vector.shape_cast %576 : vector<2x64xf32> to vector<1x2x64xf32>
    tpu.vector_store %arg7[%c5_187, %c0_188, %c0_189], %579 {strides = array<i32>} : memref<8x2x64xf32, #tpu.memory_space<vmem>>, vector<1x2x64xf32>,
    %c6_190 = arith.constant 6 : index
    %c0_191 = arith.constant 0 : index
    %c0_192 = arith.constant 0 : index
    %580 = vector.load %arg9[%c6_190, %c0_191, %c0_192] : memref<8x2x64xf32, #tpu.memory_space<vmem>>, vector<1x2x64xf32>
    %581 = vector.shape_cast %580 : vector<1x2x64xf32> to vector<2x64xf32>
    %c1_193 = arith.constant 1 : index
    %c0_194 = arith.constant 0 : index
    %c0_195 = arith.constant 0 : index
    %582 = vector.load %arg9[%c1_193, %c0_194, %c0_195] : memref<8x2x64xf32, #tpu.memory_space<vmem>>, vector<1x2x64xf32>
    %583 = vector.shape_cast %582 : vector<1x2x64xf32> to vector<2x64xf32>
    %584 = vector.extract_strided_slice %581 {offsets = [0, 0], sizes = [2, 32], strides = [1, 1]} : vector<2x64xf32> to vector<2x32xf32>
    %585 = vector.extract_strided_slice %583 {offsets = [0, 32], sizes = [2, 32], strides = [1, 1]} : vector<2x64xf32> to vector<2x32xf32>
    %586 = tpu.concatenate %584, %585 in 1 : vector<2x32xf32>, vector<2x32xf32> -> vector<2x64xf32>
    %cst_196 = arith.constant dense<0.000000e+00> : vector<2xf32>
    %587 = vector.multi_reduction <add>, %586, %cst_196 [1] : vector<2x64xf32> to vector<2xf32>
    %588 = vector.shape_cast %587 : vector<2xf32> to vector<2x1xf32>
    %cst_197 = arith.constant 1.562500e-02 : f32
    %589 = vector.broadcast %cst_197 : f32 to vector<2x1xf32>
    %590 = arith.mulf %588, %589 : vector<2x1xf32>
    %591 = vector.broadcast %590 : vector<2x1xf32> to vector<2x64xf32>
    %592 = arith.subf %586, %591 : vector<2x64xf32>
    %593 = arith.mulf %592, %592 : vector<2x64xf32>
    %cst_198 = arith.constant dense<0.000000e+00> : vector<2xf32>
    %594 = vector.multi_reduction <add>, %593, %cst_198 [1] : vector<2x64xf32> to vector<2xf32>
    %595 = vector.shape_cast %594 : vector<2xf32> to vector<2x1xf32>
    %cst_199 = arith.constant 1.562500e-02 : f32
    %596 = vector.broadcast %cst_199 : f32 to vector<2x1xf32>
    %597 = arith.mulf %595, %596 : vector<2x1xf32>
    %cst_200 = arith.constant 9.99999974E-6 : f32
    %598 = vector.broadcast %cst_200 : f32 to vector<2x1xf32>
    %599 = arith.addf %597, %598 : vector<2x1xf32>
    %600 = math.rsqrt %599 : vector<2x1xf32>
    %601 = vector.broadcast %600 : vector<2x1xf32> to vector<2x64xf32>
    %602 = arith.mulf %592, %601 : vector<2x64xf32>
    %c6_201 = arith.constant 6 : index
    %c0_202 = arith.constant 0 : index
    %c0_203 = arith.constant 0 : index
    %603 = vector.load %arg7[%c6_201, %c0_202, %c0_203] : memref<8x2x64xf32, #tpu.memory_space<vmem>>, vector<1x2x64xf32>
    %604 = vector.shape_cast %603 : vector<1x2x64xf32> to vector<2x64xf32>
    %605 = vector.shape_cast %602 : vector<2x64xf32> to vector<1x2x64xf32>
    tpu.vector_store %arg7[%c6_201, %c0_202, %c0_203], %605 {strides = array<i32>} : memref<8x2x64xf32, #tpu.memory_space<vmem>>, vector<1x2x64xf32>,
    %c7_204 = arith.constant 7 : index
    %c0_205 = arith.constant 0 : index
    %c0_206 = arith.constant 0 : index
    %606 = vector.load %arg9[%c7_204, %c0_205, %c0_206] : memref<8x2x64xf32, #tpu.memory_space<vmem>>, vector<1x2x64xf32>
    %607 = vector.shape_cast %606 : vector<1x2x64xf32> to vector<2x64xf32>
    %c0_207 = arith.constant 0 : index
    %c0_208 = arith.constant 0 : index
    %c0_209 = arith.constant 0 : index
    %608 = vector.load %arg9[%c0_207, %c0_208, %c0_209] : memref<8x2x64xf32, #tpu.memory_space<vmem>>, vector<1x2x64xf32>
    %609 = vector.shape_cast %608 : vector<1x2x64xf32> to vector<2x64xf32>
    %610 = vector.extract_strided_slice %607 {offsets = [0, 0], sizes = [2, 32], strides = [1, 1]} : vector<2x64xf32> to vector<2x32xf32>
    %611 = vector.extract_strided_slice %609 {offsets = [0, 32], sizes = [2, 32], strides = [1, 1]} : vector<2x64xf32> to vector<2x32xf32>
    %612 = tpu.concatenate %610, %611 in 1 : vector<2x32xf32>, vector<2x32xf32> -> vector<2x64xf32>
    %cst_210 = arith.constant dense<0.000000e+00> : vector<2xf32>
    %613 = vector.multi_reduction <add>, %612, %cst_210 [1] : vector<2x64xf32> to vector<2xf32>
    %614 = vector.shape_cast %613 : vector<2xf32> to vector<2x1xf32>
    %cst_211 = arith.constant 1.562500e-02 : f32
    %615 = vector.broadcast %cst_211 : f32 to vector<2x1xf32>
    %616 = arith.mulf %614, %615 : vector<2x1xf32>
    %617 = vector.broadcast %616 : vector<2x1xf32> to vector<2x64xf32>
    %618 = arith.subf %612, %617 : vector<2x64xf32>
    %619 = arith.mulf %618, %618 : vector<2x64xf32>
    %cst_212 = arith.constant dense<0.000000e+00> : vector<2xf32>
    %620 = vector.multi_reduction <add>, %619, %cst_212 [1] : vector<2x64xf32> to vector<2xf32>
    %621 = vector.shape_cast %620 : vector<2xf32> to vector<2x1xf32>
    %cst_213 = arith.constant 1.562500e-02 : f32
    %622 = vector.broadcast %cst_213 : f32 to vector<2x1xf32>
    %623 = arith.mulf %621, %622 : vector<2x1xf32>
    %cst_214 = arith.constant 9.99999974E-6 : f32
    %624 = vector.broadcast %cst_214 : f32 to vector<2x1xf32>
    %625 = arith.addf %623, %624 : vector<2x1xf32>
    %626 = math.rsqrt %625 : vector<2x1xf32>
    %627 = vector.broadcast %626 : vector<2x1xf32> to vector<2x64xf32>
    %628 = arith.mulf %618, %627 : vector<2x64xf32>
    %c7_215 = arith.constant 7 : index
    %c0_216 = arith.constant 0 : index
    %c0_217 = arith.constant 0 : index
    %629 = vector.load %arg7[%c7_215, %c0_216, %c0_217] : memref<8x2x64xf32, #tpu.memory_space<vmem>>, vector<1x2x64xf32>
    %630 = vector.shape_cast %629 : vector<1x2x64xf32> to vector<2x64xf32>
    %631 = vector.shape_cast %628 : vector<2x64xf32> to vector<1x2x64xf32>
    tpu.vector_store %arg7[%c7_215, %c0_216, %c0_217], %631 {strides = array<i32>} : memref<8x2x64xf32, #tpu.memory_space<vmem>>, vector<1x2x64xf32>,
    return
  }
}

</mosaic_0001>

<bundles_post_ra>
// kernel: encoder_qns_forward.1
= control target key start
LH: loop header
LB: loop body
LE: loop exit
PB: predicated region body
PF: predicated region fallthrough
CT: control target
= control target key end

     0   :  { %s3166_s0 = inlined_call_operand.vmem [shape: f32[16,768], index: 0, kind: input, shape index: {}]   ;;  %s3167_s1 = inlined_call_operand.vmem [shape: f32[8,2,64], index: 1, kind: input, shape index: {}]   ;;  %s3168_s2 = inlined_call_operand.vmem [shape: f32[768,32], index: 2, kind: input, shape index: {}]   ;;  %s3169_s3 = inlined_call_operand.vmem [shape: f32[1,32], index: 3, kind: input, shape index: {}]   ;;  %s3170_s4 = inlined_call_operand.vmem [shape: f32[32,256], index: 4, kind: input, shape index: {}]   ;;  %s3171_s5 = inlined_call_operand.vmem [shape: f32[1,256], index: 5, kind: input, shape index: {}]   ;;  %s3172_s6 = inlined_call_operand.vmem [shape: f32[64,256], index: 6, kind: input, shape index: {}]   ;;  %s3173_s7 = inlined_call_operand.vmem [shape: f32[8,2,64], index: 7, kind: output, shape index: {0}]   ;;  %s3174_s8 = inlined_call_operand.hbm [shape: f32[2,64], index: 8, kind: output, shape index: {1}]  }
   0x1   :  { %v57_v0 = vld [vmem:[%s3168_s2 + $0x80] sm:$0xff]  ;;  %v58_v1 = vld [vmem:[%s3168_s2 + $0x88] sm:$0xff]  ;;  %v59_v11 = vld [vmem:[%s3168_s2 + $0x90] sm:$0xff] }
   0x2   :  { %v41_v2 = vld [vmem:[%s3168_s2] sm:$0xff]  ;;  %v1897_v3 = vpack.c.bf16 %v58_v1, %v57_v0  ;;  %v42_v4 = vld [vmem:[%s3168_s2 + $0x8] sm:$0xff]  ;;  %v60_v13 = vld [vmem:[%s3168_s2 + $0x98] sm:$0xff] }
   0x3   :  { %v89_v5 = vld [vmem:[%s3168_s2 + $0x180] sm:$0xff]  ;;  %v90_v6 = vld [vmem:[%s3168_s2 + $0x188] sm:$0xff]  ;;  %v1899_v7 = vpack.c.bf16 %v42_v4, %v41_v2  ;;  %v43_v14 = vld [vmem:[%s3168_s2 + $0x10] sm:$0xff]  ;;  %v1901_v16 = vpack.c.bf16 %v60_v13, %v59_v11 }
   0x4   :  { %v1929_v8 = vpack.c.bf16 %v90_v6, %v89_v5  ;;  %v73_v9 = vld [vmem:[%s3168_s2 + $0x100] sm:$0xff]  ;;  %v74_v10 = vld [vmem:[%s3168_s2 + $0x108] sm:$0xff]  ;;  %1898 = vmatprep.subr.bf16.mxu0 %v1897_v3  ;;  %v44_v15 = vld [vmem:[%s3168_s2 + $0x18] sm:$0xff] }
   0x5   :  { %v1931_v12 = vpack.c.bf16 %v74_v10, %v73_v9  ;;  %1900 = vmatpush3.bf16.msra.mxu0 %v1899_v7  ;;  %v1903_v17 = vpack.c.bf16 %v44_v15, %v43_v14  ;;  %v91_v18 = vld [vmem:[%s3168_s2 + $0x190] sm:$0xff]  ;;  %v92_v19 = vld [vmem:[%s3168_s2 + $0x198] sm:$0xff]  ;;  %v61_v23 = vld [vmem:[%s3168_s2 + $0xa0] sm:$0xff] }
   0x6   :  { %1930 = vmatprep.subr.bf16.mxu1 %v1929_v8  ;;  %v75_v20 = vld [vmem:[%s3168_s2 + $0x110] sm:$0xff]  ;;  %v1933_v21 = vpack.c.bf16 %v92_v19, %v91_v18  ;;  %v76_v22 = vld [vmem:[%s3168_s2 + $0x118] sm:$0xff]  ;;  %v62_v24 = vld [vmem:[%s3168_s2 + $0xa8] sm:$0xff]  ;;  %1902 = vmatprep.subr.bf16.mxu0 %v1901_v16 }
   0x7   :  { %1932 = vmatpush3.bf16.msra.mxu1 %v1931_v12  ;;  %v1935_v25 = vpack.c.bf16 %v76_v22, %v75_v20  ;;  %v1905_v26 = vpack.c.bf16 %v62_v24, %v61_v23  ;;  %v45_v27 = vld [vmem:[%s3168_s2 + $0x20] sm:$0xff]  ;;  %v46_v28 = vld [vmem:[%s3168_s2 + $0x28] sm:$0xff]  ;;  %v63_v35 = vld [vmem:[%s3168_s2 + $0xb0] sm:$0xff] }
   0x8   :  { %v93_v29 = vld [vmem:[%s3168_s2 + $0x1a0] sm:$0xff]  ;;  %1934 = vmatprep.subr.bf16.mxu1 %v1933_v21  ;;  %v94_v30 = vld [vmem:[%s3168_s2 + $0x1a8] sm:$0xff]  ;;  %v1907_v33 = vpack.c.bf16 %v46_v28, %v45_v27  ;;  %v64_v36 = vld [vmem:[%s3168_s2 + $0xb8] sm:$0xff] }
   0x9   :  { %v77_v31 = vld [vmem:[%s3168_s2 + $0x120] sm:$0xff]  ;;  %v78_v32 = vld [vmem:[%s3168_s2 + $0x128] sm:$0xff]  ;;  %1904 = vmatpush3.bf16.msra.mxu0 %v1903_v17  ;;  %v1937_v34 = vpack.c.bf16 %v94_v30, %v93_v29  ;;  %v47_v37 = vld [vmem:[%s3168_s2 + $0x30] sm:$0xff]  ;;  %v1909_v39 = vpack.c.bf16 %v64_v36, %v63_v35 }
   0xa   :  { %1906 = vmatprep.subr.bf16.mxu0 %v1905_v26  ;;  %v1939_v38 = vpack.c.bf16 %v78_v32, %v77_v31  ;;  %v48_v40 = vld [vmem:[%s3168_s2 + $0x38] sm:$0xff]  ;;  %v95_v41 = vld [vmem:[%s3168_s2 + $0x1b0] sm:$0xff]  ;;  %v65_v46 = vld [vmem:[%s3168_s2 + $0xc0] sm:$0xff] }
   0xb   :  { %1936 = vmatpush3.bf16.msra.mxu1 %v1935_v25  ;;  %v96_v42 = vld [vmem:[%s3168_s2 + $0x1b8] sm:$0xff]  ;;  %v79_v44 = vld [vmem:[%s3168_s2 + $0x130] sm:$0xff]  ;;  %v66_v47 = vld [vmem:[%s3168_s2 + $0xc8] sm:$0xff]  ;;  %v1911_v48 = vpack.c.bf16 %v48_v40, %v47_v37 }
   0xc   :  { %1938 = vmatprep.subr.bf16.mxu1 %v1937_v34  ;;  %v1941_v43 = vpack.c.bf16 %v96_v42, %v95_v41  ;;  %v80_v45 = vld [vmem:[%s3168_s2 + $0x138] sm:$0xff]  ;;  %v97_v49 = vld [vmem:[%s3168_s2 + $0x1c0] sm:$0xff]  ;;  %v98_v50 = vld [vmem:[%s3168_s2 + $0x1c8] sm:$0xff]  ;;  %v1913_v52 = vpack.c.bf16 %v66_v47, %v65_v46 }
   0xd   :  { %1908 = vmatpush3.bf16.msra.mxu0 %v1907_v33  ;;  %v1943_v51 = vpack.c.bf16 %v80_v45, %v79_v44  ;;  %v49_v53 = vld [vmem:[%s3168_s2 + $0x40] sm:$0xff]  ;;  %v50_v54 = vld [vmem:[%s3168_s2 + $0x48] sm:$0xff]  ;;  %v1945_v56 = vpack.c.bf16 %v98_v50, %v97_v49  ;;  %v67_v58 = vld [vmem:[%s3168_s2 + $0xd0] sm:$0xff] }
   0xe   :  { %1910 = vmatprep.subr.bf16.mxu0 %v1909_v39  ;;  %v81_v55 = vld [vmem:[%s3168_s2 + $0x140] sm:$0xff]  ;;  %v82_v57 = vld [vmem:[%s3168_s2 + $0x148] sm:$0xff]  ;;  %v68_v59 = vld [vmem:[%s3168_s2 + $0xd8] sm:$0xff]  ;;  %v1915_v62 = vpack.c.bf16 %v50_v54, %v49_v53 }
   0xf   :  { %1940 = vmatpush3.bf16.msra.mxu1 %v1939_v38  ;;  %v99_v60 = vld [vmem:[%s3168_s2 + $0x1d0] sm:$0xff]  ;;  %v100_v61 = vld [vmem:[%s3168_s2 + $0x1d8] sm:$0xff]  ;;  %v1947_v63 = vpack.c.bf16 %v82_v57, %v81_v55  ;;  %v1917_v0 = vpack.c.bf16 %v68_v59, %v67_v58  ;;  %v69_v6 = vld [vmem:[%s3168_s2 + $0xe0] sm:$0xff] }
  0x10   :  { %1942 = vmatprep.subr.bf16.mxu1 %v1941_v43  ;;  %v51_v1 = vld [vmem:[%s3168_s2 + $0x50] sm:$0xff]  ;;  %v52_v2 = vld [vmem:[%s3168_s2 + $0x58] sm:$0xff]  ;;  %v1949_v4 = vpack.c.bf16 %v100_v61, %v99_v60  ;;  %v70_v7 = vld [vmem:[%s3168_s2 + $0xe8] sm:$0xff] }
  0x11   :  { %1912 = vmatpush3.bf16.msra.mxu0 %v1911_v48  ;;  %v83_v3 = vld [vmem:[%s3168_s2 + $0x150] sm:$0xff]  ;;  %v84_v5 = vld [vmem:[%s3168_s2 + $0x158] sm:$0xff]  ;;  %v101_v8 = vld [vmem:[%s3168_s2 + $0x1e0] sm:$0xff]  ;;  %v1919_v10 = vpack.c.bf16 %v52_v2, %v51_v1  ;;  %v1921_v14 = vpack.c.bf16 %v70_v7, %v69_v6 }
  0x12   :  { %1914 = vmatprep.subr.bf16.mxu0 %v1913_v52  ;;  %v102_v9 = vld [vmem:[%s3168_s2 + $0x1e8] sm:$0xff]  ;;  %v53_v11 = vld [vmem:[%s3168_s2 + $0x60] sm:$0xff]  ;;  %v1951_v13 = vpack.c.bf16 %v84_v5, %v83_v3  ;;  %v71_v19 = vld [vmem:[%s3168_s2 + $0xf0] sm:$0xff] }
  0x13   :  { %1944 = vmatpush3.bf16.msra.mxu1 %v1943_v51  ;;  %v30_v12 = vld [vmem:[%s3166_s0 + $0x8] sm:$0xff]  ;;  %v85_v16 = vld [vmem:[%s3168_s2 + $0x160] sm:$0xff]  ;;  %v1953_v18 = vpack.c.bf16 %v102_v9, %v101_v8  ;;  %v72_v20 = vld [vmem:[%s3168_s2 + $0xf8] sm:$0xff] }
  0x14   :  { %1946 = vmatprep.subr.bf16.mxu1 %v1945_v56  ;;  %v54_v15 = vld [vmem:[%s3168_s2 + $0x68] sm:$0xff]  ;;  %208 = vmatprep.mubr.f32.mxu0 %v30_v12  ;;  %v32_v21 = vld [vmem:[%s3166_s0 + $0x18] sm:$0xff]  ;;  %v103_v22 = vld [vmem:[%s3168_s2 + $0x1f0] sm:$0xff]  ;;  %v1925_v26 = vpack.c.bf16 %v72_v20, %v71_v19 }
  0x15   :  { %1916 = vmatpush3.bf16.msra.mxu0 %v1915_v62  ;;  %v86_v17 = vld [vmem:[%s3168_s2 + $0x168] sm:$0xff]  ;;  %v104_v23 = vld [vmem:[%s3168_s2 + $0x1f8] sm:$0xff]  ;;  %283 = vmatprep.mubr.f32.mxu1 %v32_v21  ;;  %v1923_v24 = vpack.c.bf16 %v54_v15, %v53_v11  ;;  %v55_v27 = vld [vmem:[%s3168_s2 + $0x70] sm:$0xff] }
  0x16   :  { %1918 = vmatprep.subr.bf16.mxu0 %v1917_v0  ;;  %v1955_v25 = vpack.c.bf16 %v86_v17, %v85_v16  ;;  %v56_v28 = vld [vmem:[%s3168_s2 + $0x78] sm:$0xff]  ;;  %v87_v29 = vld [vmem:[%s3168_s2 + $0x170] sm:$0xff]  ;;  %v1957_v30 = vpack.c.bf16 %v104_v23, %v103_v22  ;;  %v121_v32 = vld [vmem:[%s3168_s2 + $0x280] sm:$0xff] }
  0x17   :  { %1948 = vmatpush3.bf16.msra.mxu1 %v1947_v63  ;;  %v88_v31 = vld [vmem:[%s3168_s2 + $0x178] sm:$0xff]  ;;  %v122_v33 = vld [vmem:[%s3168_s2 + $0x288] sm:$0xff]  ;;  %v1927_v34 = vpack.c.bf16 %v56_v28, %v55_v27  ;;  %v105_v37 = vld [vmem:[%s3168_s2 + $0x200] sm:$0xff] }
  0x18   :  { %1950 = vmatprep.subr.bf16.mxu1 %v1949_v4  ;;  %v1959_v35 = vpack.c.bf16 %v88_v31, %v87_v29  ;;  %v1961_v36 = vpack.c.bf16 %v122_v33, %v121_v32  ;;  %v106_v38 = vld [vmem:[%s3168_s2 + $0x208] sm:$0xff]  ;;  %v123_v39 = vld [vmem:[%s3168_s2 + $0x290] sm:$0xff]  ;;  %v124_v40 = vld [vmem:[%s3168_s2 + $0x298] sm:$0xff] }
  0x19   :  { %1920 = vmatpush3.bf16.msra.mxu0 %v1919_v10  ;;  %v29_v41 = vld [vmem:[%s3166_s0] sm:$0xff]  ;;  %v1963_v42 = vpack.c.bf16 %v106_v38, %v105_v37  ;;  %v31_v43 = vld [vmem:[%s3166_s0 + $0x10] sm:$0xff]  ;;  %v1965_v44 = vpack.c.bf16 %v124_v40, %v123_v39  ;;  %v108_v46 = vld [vmem:[%s3168_s2 + $0x218] sm:$0xff] }
  0x1a   :  { %1922 = vmatprep.subr.bf16.mxu0 %v1921_v14  ;;  %v107_v45 = vld [vmem:[%s3168_s2 + $0x210] sm:$0xff]  ;;  %v125_v47 = vld [vmem:[%s3168_s2 + $0x2a0] sm:$0xff]  ;;  %v126_v48 = vld [vmem:[%s3168_s2 + $0x2a8] sm:$0xff] }
  0x1b   :  { %1952 = vmatpush3.bf16.msra.mxu1 %v1951_v13  ;;  %v36_v49 = vld [vmem:[%s3166_s0 + $0x38] sm:$0xff]  ;;  %v38_v50 = vld [vmem:[%s3166_s0 + $0x48] sm:$0xff]  ;;  %v1967_v51 = vpack.c.bf16 %v108_v46, %v107_v45  ;;  %v35_v52 = vld [vmem:[%s3166_s0 + $0x30] sm:$0xff] }
  0x1c   :  { %1954 = vmatprep.subr.bf16.mxu1 %v1953_v18 }
  0x1d   :  { %1924 = vmatpush3.bf16.msra.mxu0 %v1923_v24 }
  0x1e   :  { %1926 = vmatprep.subr.bf16.mxu0 %v1925_v26 }
  0x1f   :  { %1956 = vmatpush3.bf16.msra.mxu1 %v1955_v25 }
  0x20   :  { %1958 = vmatprep.subr.bf16.mxu1 %v1957_v30 }
  0x21   :  { %1928 = vmatpush3.bf16.msra.mxu0 %v1927_v34 }
  0x22   :  { %1962 = vmatprep.subr.bf16.mxu0 %v1961_v36 }
  0x23   :  { %1960 = vmatpush3.bf16.msra.mxu1 %v1959_v35 }
  0x24   :  { %209 = vmatmul.mubr.f32.vlgmr.msra.gmra.mrb[0].mxu0 %v29_v41 }
  0x25   :  { %1964 = vmatpush3.bf16.msra.mxu0 %v1963_v42 }
  0x26   :  { %284 = vmatmul.mubr.f32.vlgmr.msra.gmra.mrb[0].mxu1 %v31_v43 }
  0x27   :  { %14 = vsyncpa [#allocation4], 0  ;;  %1966 = vmatprep.subr.bf16.mxu0 %v1965_v44  ;;  %v1969_v53 = vpack.c.bf16 %v126_v48, %v125_v47  ;;  %v109_v54 = vld [vmem:[%s3168_s2 + $0x220] sm:$0xff]  ;;  %v110_v55 = vld [vmem:[%s3168_s2 + $0x228] sm:$0xff]  ;;  %213 = vmatprep.mubr.f32.mxu0 %v36_v49  ;;  %v2302_v45 = vmov 0.0   ;;  %vm391_vm0 = vcmask 261120  }
  0x28   :  { %v37_v56 = vld [vmem:[%s3166_s0 + $0x40] sm:$0xff]  ;;  %v127_v57 = vld [vmem:[%s3168_s2 + $0x2b0] sm:$0xff]  ;;  %v128_v58 = vld [vmem:[%s3168_s2 + $0x2b8] sm:$0xff]  ;;  %288 = vmatprep.mubr.f32.mxu1 %v38_v50  ;;  %214 = vmatmul.mubr.f32.gmra.mrb[2].mxu0 %v35_v52  ;;  %v1971_v60 = vpack.c.bf16 %v110_v55, %v109_v54  ;;  %s2305_s23 = smov 96   ;;  %vm491_vm2 = vcmask 523264   ;;  %vm623_vm3 = vcmask 517120  }
  0x29   :  { %v34_v59 = vld [vmem:[%s3166_s0 + $0x28] sm:$0xff]  ;;  %1968 = vmatpush3.bf16.msra.mxu0 %v1967_v51  ;;  %v1973_v61 = vpack.c.bf16 %v128_v58, %v127_v57  ;;  %v111_v62 = vld [vmem:[%s3168_s2 + $0x230] sm:$0xff]  ;;  %v112_v63 = vld [vmem:[%s3168_s2 + $0x238] sm:$0xff]  ;;  %s2306_s20 = smov [#allocation3]  }
  0x2a   :  { %289 = vmatmul.mubr.f32.gmra.mrb[2].mxu1 %v37_v56  ;;  %1970 = vmatprep.subr.bf16.mxu0 %v1969_v53  ;;  %v129_v0 = vld [vmem:[%s3168_s2 + $0x2c0] sm:$0xff]  ;;  %v130_v1 = vld [vmem:[%s3168_s2 + $0x2c8] sm:$0xff]  ;;  %v1975_v2 = vpack.c.bf16 %v112_v63, %v111_v62  ;;  %v131_v6 = vld [vmem:[%s3168_s2 + $0x2d0] sm:$0xff]  ;;  %s1725_s21 = sshll.u32 %s2306_s20, 4  ;;  %s1726_s21 = int_to_ptr.vmem [resolvable:$true] %s1725_s21 }
  0x2b   :  { %358 = vmatprep.mubr.f32.mxu0 %v34_v59  ;;  %v1977_v3 = vpack.c.bf16 %v130_v1, %v129_v0  ;;  %v113_v4 = vld [vmem:[%s3168_s2 + $0x240] sm:$0xff]  ;;  %v114_v5 = vld [vmem:[%s3168_s2 + $0x248] sm:$0xff]  ;;  %v132_v7 = vld [vmem:[%s3168_s2 + $0x2d8] sm:$0xff]  ;;  %462 = vmatprep.mubr.f32.mxu1 %v2302_v45  ;;  %p2283_p1 = scmp.lt.s32.totalorder %s1726_s21, %s1726_s21 }
  0x2c   :  { %v1979_v8 = vpack.c.bf16 %v114_v5, %v113_v4  ;;  %v1981_v9 = vpack.c.bf16 %v132_v7, %v131_v6  ;;  %v115_v10 = vld [vmem:[%s3168_s2 + $0x250] sm:$0xff]  ;;  %v116_v11 = vld [vmem:[%s3168_s2 + $0x258] sm:$0xff]  ;;  %v133_v12 = vld [vmem:[%s3168_s2 + $0x2e0] sm:$0xff] }
  0x2d   :  { %1972 = vmatpush3.bf16.msra.mxu0 %v1971_v60  ;;  %v134_v13 = vld [vmem:[%s3168_s2 + $0x2e8] sm:$0xff]  ;;  %v1983_v14 = vpack.c.bf16 %v116_v11, %v115_v10  ;;  %v117_v16 = vld [vmem:[%s3168_s2 + $0x260] sm:$0xff]  ;;  %v135_v18 = vld [vmem:[%s3168_s2 + $0x2f0] sm:$0xff] }
  0x2e   :  { %1974 = vmatprep.subr.bf16.mxu0 %v1973_v61  ;;  %v1985_v15 = vpack.c.bf16 %v134_v13, %v133_v12  ;;  %v118_v17 = vld [vmem:[%s3168_s2 + $0x268] sm:$0xff]  ;;  %v136_v19 = vld [vmem:[%s3168_s2 + $0x2f8] sm:$0xff]  ;;  %v119_v22 = vld [vmem:[%s3168_s2 + $0x270] sm:$0xff] }
  0x2f   :  { %v1987_v20 = vpack.c.bf16 %v118_v17, %v117_v16  ;;  %v1989_v21 = vpack.c.bf16 %v136_v19, %v135_v18  ;;  %v120_v23 = vld [vmem:[%s3168_s2 + $0x278] sm:$0xff]  ;;  %v33_v25 = vld [vmem:[%s3166_s0 + $0x20] sm:$0xff]  ;;  %v39_v27 = vld [vmem:[%s3166_s0 + $0x50] sm:$0xff]  ;;  %s2304_s2 = smov 32  }
  0x30   :  { %v1991_v24 = vpack.c.bf16 %v120_v23, %v119_v22  ;;  %v40_v26 = vld [vmem:[%s3166_s0 + $0x58] sm:$0xff]  ;;  %v372_v28 = vld [vmem:[%s3170_s4 + $0x8] sm:$0xff]  ;;  %v371_v31 = vld [vmem:[%s3170_s4] sm:$0xff] }
  0x31   :  { %1976 = vmatpush3.bf16.msra.mxu0 %v1975_v2  ;;  %v374_v29 = vld [vmem:[%s3170_s4 + $0x18] sm:$0xff]  ;;  %v373_v32 = vld [vmem:[%s3170_s4 + $0x10] sm:$0xff]  ;;  %v376_v34 = vld [vmem:[%s3170_s4 + $0x28] sm:$0xff] }
  0x32   :  { %1978 = vmatprep.subr.bf16.mxu0 %v1977_v3  ;;  %v1993_v30 = vpack.c.bf16 %v374_v29, %v372_v28  ;;  %v1995_v33 = vpack.c.bf16 %v373_v32, %v371_v31  ;;  %v378_v35 = vld [vmem:[%s3170_s4 + $0x38] sm:$0xff]  ;;  %v375_v37 = vld [vmem:[%s3170_s4 + $0x20] sm:$0xff]  ;;  %v377_v38 = vld [vmem:[%s3170_s4 + $0x30] sm:$0xff]  ;;  %v381_v28 = vlaneseq }
  0x33   :  { %v1997_v36 = vpack.c.bf16 %v378_v35, %v376_v34  ;;  %v1999_v39 = vpack.c.bf16 %v377_v38, %v375_v37  ;;  %v476_v40 = vld [vmem:[%s3172_s6 + $0x8] sm:$0xff]  ;;  %v478_v41 = vld [vmem:[%s3172_s6 + $0x18] sm:$0xff]  ;;  %v475_v43 = vld [vmem:[%s3172_s6] sm:$0xff] }
  0x34   :  { %1994 = vmatprep.subr.bf16.mxu1 %v1993_v30  ;;  %v2706_v42 = vpack.c.bf16 %v478_v41, %v476_v40  ;;  %v477_v44 = vld [vmem:[%s3172_s6 + $0x10] sm:$0xff]  ;;  %v480_v47 = vld [vmem:[%s3172_s6 + $0x28] sm:$0xff]  ;;  %v482_v48 = vld [vmem:[%s3172_s6 + $0x38] sm:$0xff]  ;;  %v382_v29 = vshrl.u32 %v381_v28, 7 }
  0x35   :  { %1980 = vmatpush3.bf16.msra.mxu0 %v1979_v8  ;;  %1996 = vmatpush1.bf16.msra.mxu1 %v1995_v33  ;;  %v2716_v46 = vpack.c.bf16 %v477_v44, %v475_v43  ;;  %v2727_v49 = vpack.c.bf16 %v482_v48, %v480_v47  ;;  %v479_v50 = vld [vmem:[%s3172_s6 + $0x20] sm:$0xff]  ;;  %v481_v51 = vld [vmem:[%s3172_s6 + $0x30] sm:$0xff]  ;;  %v484_v53 = vld [vmem:[%s3172_s6 + $0x48] sm:$0xff] }
  0x36   :  { %1982 = vmatprep.subr.bf16.mxu0 %v1981_v9  ;;  %1998 = vmatprep.subr.bf16.mxu1 %v1997_v36  ;;  %v2735_v52 = vpack.c.bf16 %v481_v51, %v479_v50  ;;  %v486_v54 = vld [vmem:[%s3172_s6 + $0x58] sm:$0xff]  ;;  %v483_v56 = vld [vmem:[%s3172_s6 + $0x40] sm:$0xff]  ;;  %v485_v57 = vld [vmem:[%s3172_s6 + $0x50] sm:$0xff]  ;;  %v387_v30 = vsub.s32 1, %v382_v29  ;;  %v383_v33 = vsub.s32 0, %v382_v29 }
  0x37   :  { %v2745_v55 = vpack.c.bf16 %v486_v54, %v484_v53  ;;  %v2753_v58 = vpack.c.bf16 %v485_v57, %v483_v56  ;;  %v488_v59 = vld [vmem:[%s3172_s6 + $0x68] sm:$0xff]  ;;  %v490_v60 = vld [vmem:[%s3172_s6 + $0x78] sm:$0xff]  ;;  %v487_v62 = vld [vmem:[%s3172_s6 + $0x60] sm:$0xff] }
  0x38   :  { %v2763_v61 = vpack.c.bf16 %v490_v60, %v488_v59  ;;  %v489_v63 = vld [vmem:[%s3172_s6 + $0x70] sm:$0xff]  ;;  %v1735_v2 = vld [vmem:[%s3169_s3] ss:$0 sm:$0xff]  ;;  %s2278_s3 = scalar_lea.vmem %s1726_s21, 32 }
  0x39   :  { %1984 = vmatpush3.bf16.msra.mxu0 %v1983_v14  ;;  %2000 = vmatpush1.bf16.msra.mxu1 %v1999_v39  ;;  %v2771_v0 = vpack.c.bf16 %v489_v63, %v487_v62  ;;  %v379_v31 = vld [vmem:[%s3171_s5] sm:$0x3]  ;;  %s2303_s5 = smov 64   ;;  %p2279_p0 = scmp.ne.s32.totalorder %s1726_s21, %s2278_s3 }
  0x3a   :  { %1986 = vmatprep.subr.bf16.mxu0 %v1985_v15  ;;  %2002 = vmatprep.subr.bf16.mxu1 %v2706_v42  ;;  %v388_v32 = vrot.slane %v379_v31, %v387_v30  ;;  %v384_v37 = vrot.slane %v379_v31, %v383_v33  ;;  %p2284_p2 = scmp.lt.s32.totalorder %s2278_s3, %s2278_s3 }
  0x3c   :  { %p2285_p3 = por %p2284_p2, %p2283_p1 }
  0x3d   :  { %1988 = vmatpush3.bf16.msra.mxu0 %v1987_v20 }
  0x3e   :  { %1990 = vmatprep.subr.bf16.mxu0 %v1989_v21  ;;  %p2286_p4 = pnand %p2285_p3, %p2279_p0 }
  0x41   :  { %1992 = vmatpush3.bf16.msra.mxu0 %v1991_v24 }
  0x42   :  { %2034 = vmatprep.subr.bf16.mxu0 %v2706_v42 }
  0x44   :  { %359 = vmatmul.mubr.f32.vlgmr.msra.gmra.mrb[4].mxu0 %v33_v25 }
  0x45   :  { %363 = vmatprep.mubr.f32.mxu0 %v40_v26  ;;  %2036 = vmatpush1.bf16.msra.mxu0 %v2716_v46 }
  0x46   :  { %2038 = vmatprep.subr.bf16.mxu0 %v2727_v49 }
  0x48   :  { %364 = vmatmul.mubr.f32.gmra.mrb[6].mxu0 %v39_v27 }
  0x49   :  { %829 = vmatprep.mubr.f32.mxu0 %v2302_v45  ;;  %2040 = vmatpush1.bf16.msra.mxu0 %v2735_v52 }
  0x4a   :  { %2042 = vmatprep.subr.bf16.mxu0 %v2745_v55 }
  0x4d   :  { %2044 = vmatpush1.bf16.msra.mxu0 %v2753_v58 }
  0x4e   :  { %2046 = vmatprep.subr.bf16.mxu0 %v2763_v61 }
  0x51   :  { %2048 = vmatpush1.bf16.msra.mxu0 %v2771_v0 }
  0x52   :  { %2066 = vmatprep.subr.bf16.mxu0 %v2706_v42 }
  0xf7   :  { %v1815_v1 = vpop.f32.mrb[0].mxu0 }
  0xf8   :  { %v1816_v3 = vpop.f32.mrb[1].mxu0 }
  0xf9   :  { %v1853_v4 = vpop.f32.mrb[0].mxu1  ;;  %v1817_v5 = vadd.f32 %v1816_v3, %v1815_v1 }
  0xfa   :  { %v1854_v6 = vpop.f32.mrb[1].mxu1 }
  0xfb   :  { %v1855_v7 = vadd.f32 %v1854_v6, %v1853_v4  ;;  %v211_v8 = vadd.f32 %v1817_v5, %v1735_v2  ;;  %v1818_v9 = vpop.f32.mrb[2].mxu0 }
  0xfc   :  { %v1819_v10 = vpop.f32.mrb[3].mxu0 }
  0xfd   :  { %v1856_v11 = vpop.f32.mrb[2].mxu1  ;;  %v286_v12 = vadd.f32 %v1855_v7, %v211_v8  ;;  %v1820_v13 = vadd.f32 %v1819_v10, %v1818_v9 }
  0xfe   :  { %v1857_v14 = vpop.f32.mrb[3].mxu1 }
  0xff   :  { %v1858_v15 = vadd.f32 %v1857_v14, %v1856_v11  ;;  %v216_v16 = vadd.f32 %v1820_v13, %v1735_v2  ;;  %v619_v13 = vld [vmem:[%s3167_s1] sm:$0x3] }
 0x100   :  { %vm620_vm1 = vcmp.gt.f32.partialorder %v619_v13, 0.5 }
 0x101   :  { %v291_v17 = vadd.f32 %v1858_v15, %v216_v16 }
 0x117   :  { %v1891_v18 = vpop.f32.mrb[4].mxu0 }
 0x118   :  { %v1892_v19 = vpop.f32.mrb[5].mxu0 }
 0x119   :  { %v1893_v20 = vadd.f32 %v1892_v19, %v1891_v18 }
 0x11b   :  { %v361_v21 = vadd.f32 %v1893_v20, %v286_v12  ;;  %v1894_v22 = vpop.f32.mrb[6].mxu0 }
 0x11c   :  { %v1895_v23 = vpop.f32.mrb[7].mxu0 }
 0x11d   :  { %v369_v24 = vmax.f32 %v361_v21, 0.0  ;;  %v1896_v25 = vadd.f32 %v1895_v23, %v1894_v22 }
 0x11f   :  { %v366_v26 = vadd.f32 %v1896_v25, %v291_v17  ;;  %1736 = vmatmul.mubr.msk.f32.vlgmr.msra.gmra.mrb[4].mxu1 %vm391_vm0, %v369_v24 }
 0x120   :  { %2004 = vmatpush1.bf16.msra.mxu1 %v2716_v46  ;;  %468 = vmatprep.mubr.f32.mxu1 %v2302_v45 }
 0x121   :  { %v370_v27 = vmax.f32 %v366_v26, 0.0  ;;  %2006 = vmatprep.subr.bf16.mxu1 %v2727_v49 }
 0x123   :  { %1737 = vmatmul.mubr.msk.f32.gmra.mrb[6].mxu1 %vm391_vm0, %v370_v27 }
 0x124   :  { %2008 = vmatpush1.bf16.msra.mxu1 %v2735_v52  ;;  %559 = vmatprep.mubr.f32.mxu1 %v2302_v45 }
 0x125   :  { %2010 = vmatprep.subr.bf16.mxu1 %v2745_v55 }
 0x128   :  { %2012 = vmatpush1.bf16.msra.mxu1 %v2753_v58 }
 0x129   :  { %2014 = vmatprep.subr.bf16.mxu1 %v2763_v61 }
 0x12c   :  { %2016 = vmatpush1.bf16.msra.mxu1 %v2771_v0 }
 0x12d   :  { %2018 = vmatprep.subr.bf16.mxu1 %v2706_v42 }
 0x12f   :  { %560 = vmatmul.mubr.f32.vlgmr.msra.gmra.mrb[8].mxu1 %v2302_v45 }
 0x130   :  { %2020 = vmatpush1.bf16.msra.mxu1 %v2716_v46  ;;  %692 = vmatprep.mubr.f32.mxu1 %v2302_v45 }
 0x131   :  { %2022 = vmatprep.subr.bf16.mxu1 %v2727_v49 }
 0x134   :  { %2024 = vmatpush1.bf16.msra.mxu1 %v2735_v52 }
 0x135   :  { %2026 = vmatprep.subr.bf16.mxu1 %v2745_v55 }
 0x138   :  { %2028 = vmatpush1.bf16.msra.mxu1 %v2753_v58 }
 0x139   :  { %2030 = vmatprep.subr.bf16.mxu1 %v2763_v61 }
 0x13c   :  { %2032 = vmatpush1.bf16.msra.mxu1 %v2771_v0 }
 0x13d   :  { %2050 = vmatprep.subr.bf16.mxu1 %v2706_v42 }
 0x1f2   :  { %v464_v34 = vpop.f32.mrb[4].mxu1 }
 0x1f3   :  { %v466_v35 = vpop.f32.mrb[5].mxu1  ;;  %v2810_v43 = vadd.f32 %v464_v34, %v384_v37 }
 0x1f4   :  { %v2804_v36 = vadd.f32 %v466_v35, %v388_v32 }
 0x1f5   :  { %v700_v24 = vrot.slane %v2810_v43, 2 }
 0x1f6   :  { %v470_v38 = vpop.f32.mrb[6].mxu1 }
 0x1f7   :  { %v2806_v39 = vadd.f32 %v470_v38, %v384_v37  ;;  %v472_v40 = vpop.f32.mrb[7].mxu1 }
 0x1f8   :  { %v2808_v41 = vadd.f32 %v472_v40, %v388_v32 }
 0x1fa   :  { %v568_v47 = vrot.slane %v2808_v41, 6  ;;  %v703_v26 = vrot.slane %v2808_v41, 4  ;;  %v839_v13 = vrot.slane %v2808_v41, 2 }
 0x202   :  { %v561_v44 = vpop.f32.mrb[8].mxu1 }
 0x203   :  { %v566_v48 = vadd.f32 %v561_v44, %v2810_v43  ;;  %v563_v50 = vpop.f32.mrb[9].mxu1 }
 0x204   :  { %v570_v51 = vadd.f32 %v568_v47, %v563_v50 }
 0x205   :  { %593 = vrot.lane.b32.xlu1 %v566_v48, %s2303_s5 }
 0x206   :  { %572 = vrot.lane.b32.xlu0 %v570_v51, %s2304_s2 }
 0x209   :  { %596 = vrot.lane.b32.xlu1 %v570_v51, %s2305_s23 }
 0x20a   :  { %583 = vrot.lane.b32.xlu0 %v566_v48, %s2305_s23 }
 0x20d   :  { %604 = vrot.lane.b32.xlu1 %v570_v51, %s2303_s5 }
 0x20e   :  { %601 = vrot.lane.b32.xlu0 %v566_v48, %s2304_s2 }
 0x277   :  { %v594_v53 = vpop.permute.xlu1 %593 }
 0x278   :  { %v573_v54 = vpop.permute.xlu0 %572 }
 0x279   :  { %v575_v56 = vsel %vm391_vm0, %v566_v48, %v573_v54 }
 0x27a   :  { %v1738_v57 = vmul.f32 -1.442695, %v575_v56 }
 0x27b   :  { %v597_v59 = vpop.permute.xlu1 %596 }
 0x27c   :  { %2134 = vpow2.f32 %v1738_v57  ;;  %v584_v60 = vpop.permute.xlu0 %583  ;;  %v599_v7 = vsel %vm391_vm0, %v594_v53, %v597_v59 }
 0x27d   :  { %v586_v62 = vsel %vm391_vm0, %v584_v60, %v570_v51 }
 0x27e   :  { %v1739_v63 = vmul.f32 -1.442695, %v586_v62  ;;  %v1745_v62 = vld [vmem:[%s3167_s1 + $0x2] sm:$0x3] }
 0x27f   :  { %v605_v1 = vpop.permute.xlu1 %604  ;;  %vm756_vm4 = vcmp.gt.f32.partialorder %v1745_v62, 0.5 }
 0x280   :  { %2136 = vpow2.f32 %v1739_v63  ;;  %v602_v2 = vpop.permute.xlu0 %601 }
 0x281   :  { %v607_v3 = vsel %vm391_vm0, %v602_v2, %v605_v1 }
 0x282   :  { %v1740_v5 = vmul.f32 -1.442695, %v607_v3 }
 0x284   :  { %2138 = vpow2.f32 %v1740_v5 }
 0x286   :  { %v2135_v4 = vpop.eup %2134 }
 0x287   :  { %v579_v6 = vadd.f32 1.0, %v2135_v4 }
 0x289   :  { %2140 = vrcp.f32 %v579_v6 }
 0x28a   :  { %v2137_v8 = vpop.eup %2136  ;;  %2142 = vtanh.f32 %v599_v7 }
 0x28b   :  { %v590_v9 = vadd.f32 1.0, %v2137_v8 }
 0x28d   :  { %2144 = vrcp.f32 %v590_v9 }
 0x28e   :  { %v2139_v10 = vpop.eup %2138 }
 0x28f   :  { %v611_v15 = vadd.f32 1.0, %v2139_v10 }
 0x291   :  { %2146 = vrcp.f32 %v611_v15 }
 0x293   :  { %v2141_v11 = vpop.eup %2140 }
 0x294   :  { %v2143_v12 = vpop.eup %2142 }
 0x295   :  { %v615_v17 = vmul.f32 %v2143_v12, %v2141_v11  ;;  %v836_v11 = vrot.slane %v2810_v43, 4 }
 0x297   :  { %v2145_v14 = vpop.eup %2144 }
 0x298   :  { %v614_v16 = vmul.f32 0.0, %v2145_v14 }
 0x29a   :  { %v616_v18 = vadd.f32 %v615_v17, %v614_v16 }
 0x29b   :  { %v2147_v20 = vpop.eup %2146 }
 0x29c   :  { %2148 = vtanh.f32 %v616_v18  ;;  %v2827_v19 = vsel %vm620_vm1, %v616_v18, 0.0 }
 0x2a6   :  { %v2149_v21 = vpop.eup %2148 }
 0x2a7   :  { %v618_v22 = vmul.f32 %v2149_v21, %v2147_v20 }
 0x2a9   :  { %v2829_v23 = vsel %vm620_vm1, %v618_v22, 0.0 }
 0x2aa   :  { %624 = vst.msk [vmem:[#allocation2] sm:$0x3] %vm623_vm3, %v2829_v23  ;;  %1741 = vmatmul.mubr.msk.f32.vlgmr.msra.gmra.mrb[10].mxu1 %vm491_vm2, %v2829_v23 }
 0x2ab   :  { %2052 = vmatpush1.bf16.msra.mxu1 %v2716_v46  ;;  %965 = vmatprep.mubr.f32.mxu1 %v2302_v45 }
 0x2ac   :  { %2054 = vmatprep.subr.bf16.mxu1 %v2727_v49 }
 0x2af   :  { %2056 = vmatpush1.bf16.msra.mxu1 %v2735_v52 }
 0x2b0   :  { %2058 = vmatprep.subr.bf16.mxu1 %v2745_v55 }
 0x2b3   :  { %2060 = vmatpush1.bf16.msra.mxu1 %v2753_v58 }
 0x2b4   :  { %2062 = vmatprep.subr.bf16.mxu1 %v2763_v61 }
 0x2b7   :  { %2064 = vmatpush1.bf16.msra.mxu1 %v2771_v0 }
 0x2b8   :  { %2082 = vmatprep.subr.bf16.mxu1 %v2706_v42 }
 0x37d   :  { %v694_v25 = vpop.f32.mrb[10].mxu1 }
 0x37e   :  { %v702_v27 = vadd.f32 %v700_v24, %v694_v25  ;;  %v696_v28 = vpop.f32.mrb[11].mxu1 }
 0x37f   :  { %v705_v29 = vadd.f32 %v703_v26, %v696_v28 }
 0x380   :  { %718 = vrot.lane.b32.xlu1 %v702_v27, %s2305_s23 }
 0x381   :  { %707 = vrot.lane.b32.xlu0 %v705_v29, %s2304_s2 }
 0x384   :  { %731 = vrot.lane.b32.xlu1 %v705_v29, %s2305_s23 }
 0x385   :  { %728 = vrot.lane.b32.xlu0 %v702_v27, %s2303_s5 }
 0x388   :  { %739 = vrot.lane.b32.xlu1 %v705_v29, %s2303_s5 }
 0x389   :  { %736 = vrot.lane.b32.xlu0 %v702_v27, %s2304_s2 }
 0x3f2   :  { %v719_v30 = vpop.permute.xlu1 %718 }
 0x3f3   :  { %v721_v31 = vsel %vm391_vm0, %v719_v30, %v705_v29  ;;  %v708_v32 = vpop.permute.xlu0 %707 }
 0x3f4   :  { %v1743_v33 = vmul.f32 -1.442695, %v721_v31  ;;  %v710_v34 = vsel %vm391_vm0, %v702_v27, %v708_v32 }
 0x3f5   :  { %v1742_v35 = vmul.f32 -1.442695, %v710_v34 }
 0x3f6   :  { %2150 = vpow2.f32 %v1743_v33  ;;  %v732_v37 = vpop.permute.xlu1 %731 }
 0x3f7   :  { %2152 = vpow2.f32 %v1742_v35  ;;  %v729_v38 = vpop.permute.xlu0 %728 }
 0x3f8   :  { %v734_v50 = vsel %vm391_vm0, %v729_v38, %v732_v37  ;;  %v1750_v38 = vld [vmem:[%s3167_s1 + $0x4] sm:$0x3] }
 0x3f9   :  { %vm892_vm5 = vcmp.gt.f32.partialorder %v1750_v38, 0.5 }
 0x3fa   :  { %v740_v40 = vpop.permute.xlu1 %739 }
 0x3fb   :  { %v737_v44 = vpop.permute.xlu0 %736 }
 0x3fc   :  { %v742_v47 = vsel %vm391_vm0, %v737_v44, %v740_v40 }
 0x3fd   :  { %v1744_v48 = vmul.f32 -1.442695, %v742_v47 }
 0x3ff   :  { %2154 = vpow2.f32 %v1744_v48 }
 0x400   :  { %v2151_v51 = vpop.eup %2150  ;;  %2156 = vtanh.f32 %v734_v50 }
 0x401   :  { %v2153_v53 = vpop.eup %2152  ;;  %v725_v54 = vadd.f32 1.0, %v2151_v51 }
 0x402   :  { %v714_v56 = vadd.f32 1.0, %v2153_v53 }
 0x403   :  { %2158 = vrcp.f32 %v725_v54 }
 0x404   :  { %2160 = vrcp.f32 %v714_v56 }
 0x409   :  { %v2155_v57 = vpop.eup %2154 }
 0x40a   :  { %v2157_v59 = vpop.eup %2156  ;;  %v746_v2 = vadd.f32 1.0, %v2155_v57 }
 0x40c   :  { %2162 = vrcp.f32 %v746_v2 }
 0x40d   :  { %v2159_v60 = vpop.eup %2158 }
 0x40e   :  { %v2161_v63 = vpop.eup %2160  ;;  %v749_v1 = vmul.f32 %v2159_v60, %v2827_v19  ;;  %v972_v60 = vrot.slane %v2810_v43, 6 }
 0x40f   :  { %v750_v3 = vmul.f32 %v2161_v63, %v2157_v59 }
 0x411   :  { %v751_v4 = vadd.f32 %v750_v3, %v749_v1 }
 0x413   :  { %2164 = vtanh.f32 %v751_v4  ;;  %v2861_v5 = vsel %vm756_vm4, %v751_v4, %v2827_v19 }
 0x416   :  { %v2163_v6 = vpop.eup %2162 }
 0x41d   :  { %v2165_v7 = vpop.eup %2164 }
 0x41e   :  { %v753_v8 = vmul.f32 %v2165_v7, %v2163_v6 }
 0x420   :  { %v2864_v9 = vsel %vm756_vm4, %v753_v8, %v2829_v23  ;;  %v759_v10 = vsel %vm756_vm4, %v753_v8, 0.0 }
 0x421   :  { %761 = vst.msk [vmem:[#allocation2 + $0x2] sm:$0x3] %vm623_vm3, %v759_v10  ;;  %1746 = vmatmul.mubr.msk.f32.vlgmr.msra.gmra.mrb[8].mxu0 %vm491_vm2, %v2864_v9 }
 0x422   :  { %2068 = vmatpush1.bf16.msra.mxu0 %v2716_v46  ;;  %1099 = vmatprep.mubr.f32.mxu0 %v2302_v45 }
 0x423   :  { %2070 = vmatprep.subr.bf16.mxu0 %v2727_v49 }
 0x426   :  { %2072 = vmatpush1.bf16.msra.mxu0 %v2735_v52 }
 0x427   :  { %2074 = vmatprep.subr.bf16.mxu0 %v2745_v55 }
 0x42a   :  { %2076 = vmatpush1.bf16.msra.mxu0 %v2753_v58 }
 0x42b   :  { %2078 = vmatprep.subr.bf16.mxu0 %v2763_v61 }
 0x42e   :  { %2080 = vmatpush1.bf16.msra.mxu0 %v2771_v0 }
 0x42f   :  { %2098 = vmatprep.subr.bf16.mxu0 %v2706_v42 }
 0x4f4   :  { %v831_v12 = vpop.f32.mrb[8].mxu0 }
 0x4f5   :  { %v838_v14 = vadd.f32 %v836_v11, %v831_v12  ;;  %v833_v15 = vpop.f32.mrb[9].mxu0 }
 0x4f6   :  { %v841_v16 = vadd.f32 %v839_v13, %v833_v15 }
 0x4f7   :  { %854 = vrot.lane.b32.xlu1 %v838_v14, %s2305_s23 }
 0x4f8   :  { %843 = vrot.lane.b32.xlu0 %v841_v16, %s2304_s2 }
 0x4fb   :  { %867 = vrot.lane.b32.xlu1 %v841_v16, %s2305_s23 }
 0x4fc   :  { %864 = vrot.lane.b32.xlu0 %v838_v14, %s2303_s5 }
 0x4ff   :  { %875 = vrot.lane.b32.xlu1 %v841_v16, %s2303_s5 }
 0x500   :  { %872 = vrot.lane.b32.xlu0 %v838_v14, %s2304_s2 }
 0x569   :  { %v855_v17 = vpop.permute.xlu1 %854 }
 0x56a   :  { %v857_v18 = vsel %vm391_vm0, %v855_v17, %v841_v16  ;;  %v844_v19 = vpop.permute.xlu0 %843 }
 0x56b   :  { %v1748_v20 = vmul.f32 -1.442695, %v857_v18  ;;  %v846_v21 = vsel %vm391_vm0, %v838_v14, %v844_v19 }
 0x56c   :  { %v1747_v22 = vmul.f32 -1.442695, %v846_v21 }
 0x56d   :  { %2166 = vpow2.f32 %v1748_v20  ;;  %v868_v23 = vpop.permute.xlu1 %867  ;;  %v1755_v20 = vld [vmem:[%s3167_s1 + $0x6] sm:$0x3] }
 0x56e   :  { %2168 = vpow2.f32 %v1747_v22  ;;  %v865_v24 = vpop.permute.xlu0 %864  ;;  %vm1026_vm6 = vcmp.gt.f32.partialorder %v1755_v20, 0.5 }
 0x56f   :  { %v870_v29 = vsel %vm391_vm0, %v865_v24, %v868_v23 }
 0x571   :  { %v876_v25 = vpop.permute.xlu1 %875 }
 0x572   :  { %v873_v26 = vpop.permute.xlu0 %872 }
 0x573   :  { %v878_v27 = vsel %vm391_vm0, %v873_v26, %v876_v25 }
 0x574   :  { %v1749_v28 = vmul.f32 -1.442695, %v878_v27 }
 0x576   :  { %2170 = vpow2.f32 %v1749_v28 }
 0x577   :  { %v2167_v30 = vpop.eup %2166  ;;  %2172 = vtanh.f32 %v870_v29 }
 0x578   :  { %v2169_v31 = vpop.eup %2168  ;;  %v861_v32 = vadd.f32 1.0, %v2167_v30 }
 0x579   :  { %v850_v33 = vadd.f32 1.0, %v2169_v31 }
 0x57a   :  { %2174 = vrcp.f32 %v861_v32 }
 0x57b   :  { %2176 = vrcp.f32 %v850_v33  ;;  %v1108_v33 = vrot.slane %v2804_v36, 6 }
 0x580   :  { %v2171_v34 = vpop.eup %2170 }
 0x581   :  { %v2173_v35 = vpop.eup %2172  ;;  %v882_v44 = vadd.f32 1.0, %v2171_v34 }
 0x583   :  { %2178 = vrcp.f32 %v882_v44 }
 0x584   :  { %v2175_v37 = vpop.eup %2174 }
 0x585   :  { %v2177_v40 = vpop.eup %2176  ;;  %v885_v47 = vmul.f32 %v2175_v37, %v2861_v5 }
 0x586   :  { %v886_v48 = vmul.f32 %v2177_v40, %v2173_v35 }
 0x588   :  { %v887_v50 = vadd.f32 %v886_v48, %v885_v47 }
 0x58a   :  { %2180 = vtanh.f32 %v887_v50  ;;  %v2895_v51 = vsel %vm892_vm5, %v887_v50, %v2861_v5 }
 0x58d   :  { %v2179_v53 = vpop.eup %2178 }
 0x594   :  { %v2181_v54 = vpop.eup %2180 }
 0x595   :  { %v889_v56 = vmul.f32 %v2181_v54, %v2179_v53 }
 0x597   :  { %v2898_v57 = vsel %vm892_vm5, %v889_v56, %v2864_v9  ;;  %v895_v59 = vsel %vm892_vm5, %v889_v56, 0.0 }
 0x598   :  { %897 = vst.msk [vmem:[#allocation2 + $0x4] sm:$0x3] %vm623_vm3, %v895_v59  ;;  %1751 = vmatmul.mubr.msk.f32.vlgmr.msra.gmra.mrb[12].mxu1 %vm491_vm2, %v2898_v57 }
 0x599   :  { %2084 = vmatpush1.bf16.msra.mxu1 %v2716_v46  ;;  %1234 = vmatprep.mubr.f32.mxu1 %v2302_v45 }
 0x59a   :  { %2086 = vmatprep.subr.bf16.mxu1 %v2727_v49 }
 0x59d   :  { %2088 = vmatpush1.bf16.msra.mxu1 %v2735_v52 }
 0x59e   :  { %2090 = vmatprep.subr.bf16.mxu1 %v2745_v55 }
 0x5a1   :  { %2092 = vmatpush1.bf16.msra.mxu1 %v2753_v58 }
 0x5a2   :  { %2094 = vmatprep.subr.bf16.mxu1 %v2763_v61 }
 0x5a5   :  { %2096 = vmatpush1.bf16.msra.mxu1 %v2771_v0 }
 0x5a6   :  { %2114 = vmatprep.subr.bf16.mxu1 %v2706_v42 }
 0x66b   :  { %v967_v62 = vpop.f32.mrb[12].mxu1 }
 0x66c   :  { %v974_v63 = vadd.f32 %v972_v60, %v967_v62  ;;  %v969_v1 = vpop.f32.mrb[13].mxu1 }
 0x66d   :  { %v975_v2 = vadd.f32 %v969_v1, %v2808_v41 }
 0x66e   :  { %988 = vrot.lane.b32.xlu1 %v974_v63, %s2305_s23 }
 0x66f   :  { %977 = vrot.lane.b32.xlu0 %v975_v2, %s2304_s2 }
 0x672   :  { %1001 = vrot.lane.b32.xlu1 %v975_v2, %s2305_s23 }
 0x673   :  { %998 = vrot.lane.b32.xlu0 %v974_v63, %s2303_s5 }
 0x676   :  { %1009 = vrot.lane.b32.xlu1 %v975_v2, %s2303_s5 }
 0x677   :  { %1006 = vrot.lane.b32.xlu0 %v974_v63, %s2304_s2 }
 0x6e0   :  { %v989_v42 = vpop.permute.xlu1 %988 }
 0x6e1   :  { %v991_v43 = vsel %vm391_vm0, %v989_v42, %v975_v2  ;;  %v978_v3 = vpop.permute.xlu0 %977 }
 0x6e2   :  { %v1753_v4 = vmul.f32 -1.442695, %v991_v43  ;;  %v980_v5 = vsel %vm391_vm0, %v974_v63, %v978_v3 }
 0x6e3   :  { %v1752_v41 = vmul.f32 -1.442695, %v980_v5 }
 0x6e4   :  { %2182 = vpow2.f32 %v1753_v4  ;;  %v1002_v6 = vpop.permute.xlu1 %1001  ;;  %v1760_v4 = vld [vmem:[%s3167_s1 + $0x8] sm:$0x3] }
 0x6e5   :  { %2184 = vpow2.f32 %v1752_v41  ;;  %v999_v7 = vpop.permute.xlu0 %998  ;;  %vm1161_vm7 = vcmp.gt.f32.partialorder %v1760_v4, 0.5 }
 0x6e6   :  { %v1004_v12 = vsel %vm391_vm0, %v999_v7, %v1002_v6 }
 0x6e8   :  { %v1010_v8 = vpop.permute.xlu1 %1009 }
 0x6e9   :  { %v1007_v9 = vpop.permute.xlu0 %1006 }
 0x6ea   :  { %v1012_v10 = vsel %vm391_vm0, %v1007_v9, %v1010_v8 }
 0x6eb   :  { %v1754_v11 = vmul.f32 -1.442695, %v1012_v10 }
 0x6ed   :  { %2186 = vpow2.f32 %v1754_v11 }
 0x6ee   :  { %v2183_v13 = vpop.eup %2182  ;;  %2188 = vtanh.f32 %v1004_v12 }
 0x6ef   :  { %v2185_v14 = vpop.eup %2184  ;;  %v995_v15 = vadd.f32 1.0, %v2183_v13 }
 0x6f0   :  { %v984_v16 = vadd.f32 1.0, %v2185_v14 }
 0x6f1   :  { %2190 = vrcp.f32 %v995_v15  ;;  %v1242_v15 = vrot.slane %v2806_v39, 2 }
 0x6f2   :  { %2192 = vrcp.f32 %v984_v16 }
 0x6f7   :  { %v2187_v17 = vpop.eup %2186 }
 0x6f8   :  { %v2189_v18 = vpop.eup %2188  ;;  %v1016_v22 = vadd.f32 1.0, %v2187_v17  ;;  %v1245_v17 = vrot.slane %v2804_v36, 4 }
 0x6fa   :  { %2194 = vrcp.f32 %v1016_v22 }
 0x6fb   :  { %v2191_v19 = vpop.eup %2190 }
 0x6fc   :  { %v2193_v21 = vpop.eup %2192  ;;  %v1019_v23 = vmul.f32 %v2191_v19, %v2895_v51 }
 0x6fd   :  { %v1020_v24 = vmul.f32 %v2193_v21, %v2189_v18 }
 0x6ff   :  { %v1021_v25 = vadd.f32 %v1020_v24, %v1019_v23 }
 0x701   :  { %2196 = vtanh.f32 %v1021_v25  ;;  %v2929_v26 = vsel %vm1026_vm6, %v1021_v25, %v2895_v51 }
 0x704   :  { %v2195_v27 = vpop.eup %2194 }
 0x70b   :  { %v2197_v28 = vpop.eup %2196 }
 0x70c   :  { %v1023_v29 = vmul.f32 %v2197_v28, %v2195_v27 }
 0x70e   :  { %v2932_v30 = vsel %vm1026_vm6, %v1023_v29, %v2898_v57  ;;  %v1029_v31 = vsel %vm1026_vm6, %v1023_v29, 0.0 }
 0x70f   :  { %1031 = vst.msk [vmem:[#allocation2 + $0x6] sm:$0x3] %vm623_vm3, %v1029_v31  ;;  %1756 = vmatmul.mubr.msk.f32.vlgmr.msra.gmra.mrb[10].mxu0 %vm491_vm2, %v2932_v30 }
 0x710   :  { %2100 = vmatpush1.bf16.msra.mxu0 %v2716_v46  ;;  %1371 = vmatprep.mubr.f32.mxu0 %v2302_v45 }
 0x711   :  { %2102 = vmatprep.subr.bf16.mxu0 %v2727_v49 }
 0x714   :  { %2104 = vmatpush1.bf16.msra.mxu0 %v2735_v52 }
 0x715   :  { %2106 = vmatprep.subr.bf16.mxu0 %v2745_v55 }
 0x718   :  { %2108 = vmatpush1.bf16.msra.mxu0 %v2753_v58 }
 0x719   :  { %2110 = vmatprep.subr.bf16.mxu0 %v2763_v61 }
 0x71c   :  { %2112 = vmatpush1.bf16.msra.mxu0 %v2771_v0 }
 0x7e2   :  { %v1101_v32 = vpop.f32.mrb[10].mxu0 }
 0x7e3   :  { %v1106_v34 = vadd.f32 %v1101_v32, %v2806_v39  ;;  %v1103_v35 = vpop.f32.mrb[11].mxu0 }
 0x7e4   :  { %v1110_v37 = vadd.f32 %v1108_v33, %v1103_v35  ;;  %v1765_v33 = vld [vmem:[%s3167_s1 + $0xa] sm:$0x3] }
 0x7e5   :  { %1123 = vrot.lane.b32.xlu1 %v1106_v34, %s2305_s23  ;;  %vm1298_vm8 = vcmp.gt.f32.partialorder %v1765_v33, 0.5 }
 0x7e6   :  { %1112 = vrot.lane.b32.xlu0 %v1110_v37, %s2304_s2 }
 0x7e9   :  { %1136 = vrot.lane.b32.xlu1 %v1110_v37, %s2305_s23 }
 0x7ea   :  { %1133 = vrot.lane.b32.xlu0 %v1106_v34, %s2303_s5 }
 0x7ed   :  { %1144 = vrot.lane.b32.xlu1 %v1110_v37, %s2303_s5 }
 0x7ee   :  { %1141 = vrot.lane.b32.xlu0 %v1106_v34, %s2304_s2 }
 0x857   :  { %v1124_v38 = vpop.permute.xlu1 %1123 }
 0x858   :  { %v1126_v40 = vsel %vm391_vm0, %v1124_v38, %v1110_v37  ;;  %v1113_v44 = vpop.permute.xlu0 %1112 }
 0x859   :  { %v1758_v47 = vmul.f32 -1.442695, %v1126_v40  ;;  %v1115_v48 = vsel %vm391_vm0, %v1106_v34, %v1113_v44 }
 0x85a   :  { %v1757_v50 = vmul.f32 -1.442695, %v1115_v48 }
 0x85b   :  { %2198 = vpow2.f32 %v1758_v47  ;;  %v1137_v51 = vpop.permute.xlu1 %1136 }
 0x85c   :  { %2200 = vpow2.f32 %v1757_v50  ;;  %v1134_v53 = vpop.permute.xlu0 %1133 }
 0x85d   :  { %v1139_v60 = vsel %vm391_vm0, %v1134_v53, %v1137_v51 }
 0x85f   :  { %v1145_v54 = vpop.permute.xlu1 %1144 }
 0x860   :  { %v1142_v56 = vpop.permute.xlu0 %1141 }
 0x861   :  { %v1147_v57 = vsel %vm391_vm0, %v1142_v56, %v1145_v54  ;;  %v1378_v54 = vrot.slane %v2806_v39, 4 }
 0x862   :  { %v1759_v59 = vmul.f32 -1.442695, %v1147_v57  ;;  %v1381_v57 = vrot.slane %v2804_v36, 2 }
 0x864   :  { %2202 = vpow2.f32 %v1759_v59 }
 0x865   :  { %v2199_v62 = vpop.eup %2198  ;;  %2204 = vtanh.f32 %v1139_v60 }
 0x866   :  { %v2201_v63 = vpop.eup %2200  ;;  %v1130_v1 = vadd.f32 1.0, %v2199_v62 }
 0x867   :  { %v1119_v2 = vadd.f32 1.0, %v2201_v63 }
 0x868   :  { %2206 = vrcp.f32 %v1130_v1 }
 0x869   :  { %2208 = vrcp.f32 %v1119_v2 }
 0x86e   :  { %v2203_v42 = vpop.eup %2202 }
 0x86f   :  { %v2205_v43 = vpop.eup %2204  ;;  %v1151_v41 = vadd.f32 1.0, %v2203_v42 }
 0x871   :  { %2210 = vrcp.f32 %v1151_v41 }
 0x872   :  { %v2207_v3 = vpop.eup %2206 }
 0x873   :  { %v2209_v5 = vpop.eup %2208  ;;  %v1154_v6 = vmul.f32 %v2207_v3, %v2929_v26 }
 0x874   :  { %v1155_v7 = vmul.f32 %v2209_v5, %v2205_v43 }
 0x876   :  { %v1156_v8 = vadd.f32 %v1155_v7, %v1154_v6 }
 0x878   :  { %2212 = vtanh.f32 %v1156_v8  ;;  %v2962_v9 = vsel %vm1161_vm7, %v1156_v8, %v2929_v26 }
 0x87b   :  { %v2211_v10 = vpop.eup %2210 }
 0x882   :  { %v2213_v11 = vpop.eup %2212 }
 0x883   :  { %v1158_v12 = vmul.f32 %v2213_v11, %v2211_v10 }
 0x885   :  { %v2965_v13 = vsel %vm1161_vm7, %v1158_v12, %v2932_v30  ;;  %v1164_v14 = vsel %vm1161_vm7, %v1158_v12, 0.0 }
 0x886   :  { %1166 = vst.msk [vmem:[#allocation2 + $0x8] sm:$0x3] %vm623_vm3, %v1164_v14  ;;  %1761 = vmatmul.mubr.msk.f32.vlgmr.msra.gmra.mrb[14].mxu1 %vm491_vm2, %v2965_v13 }
 0x887   :  { %2116 = vmatpush1.bf16.msra.mxu1 %v2716_v46  ;;  %1507 = vmatprep.mubr.f32.mxu1 %v2302_v45 }
 0x888   :  { %2118 = vmatprep.subr.bf16.mxu1 %v2727_v49 }
 0x88b   :  { %2120 = vmatpush1.bf16.msra.mxu1 %v2735_v52 }
 0x88c   :  { %2122 = vmatprep.subr.bf16.mxu1 %v2745_v55 }
 0x88f   :  { %2124 = vmatpush1.bf16.msra.mxu1 %v2753_v58 }
 0x890   :  { %2126 = vmatprep.subr.bf16.mxu1 %v2763_v61 }
 0x893   :  { %2128 = vmatpush1.bf16.msra.mxu1 %v2771_v0 }
 0x959   :  { %v1236_v16 = vpop.f32.mrb[14].mxu1 }
 0x95a   :  { %v1244_v46 = vadd.f32 %v1242_v15, %v1236_v16  ;;  %v1238_v18 = vpop.f32.mrb[15].mxu1 }
 0x95b   :  { %v1247_v45 = vadd.f32 %v1245_v17, %v1238_v18  ;;  %v1770_v17 = vld [vmem:[%s3167_s1 + $0xc] sm:$0x3] }
 0x95c   :  { %1260 = vrot.lane.b32.xlu1 %v1244_v46, %s2305_s23  ;;  %vm1434_vm9 = vcmp.gt.f32.partialorder %v1770_v17, 0.5 }
 0x95d   :  { %1249 = vrot.lane.b32.xlu0 %v1247_v45, %s2304_s2 }
 0x960   :  { %1273 = vrot.lane.b32.xlu1 %v1247_v45, %s2305_s23 }
 0x961   :  { %1270 = vrot.lane.b32.xlu0 %v1244_v46, %s2303_s5 }
 0x964   :  { %1281 = vrot.lane.b32.xlu1 %v1247_v45, %s2303_s5 }
 0x965   :  { %1278 = vrot.lane.b32.xlu0 %v1244_v46, %s2304_s2 }
 0x9ce   :  { %v1261_v49 = vpop.permute.xlu1 %1260 }
 0x9cf   :  { %v1263_v52 = vsel %vm391_vm0, %v1261_v49, %v1247_v45  ;;  %v1250_v55 = vpop.permute.xlu0 %1249 }
 0x9d0   :  { %v1763_v58 = vmul.f32 -1.442695, %v1263_v52  ;;  %v1252_v61 = vsel %vm391_vm0, %v1244_v46, %v1250_v55 }
 0x9d1   :  { %v1762_v0 = vmul.f32 -1.442695, %v1252_v61 }
 0x9d2   :  { %2214 = vpow2.f32 %v1763_v58  ;;  %v1274_v19 = vpop.permute.xlu1 %1273 }
 0x9d3   :  { %2216 = vpow2.f32 %v1762_v0  ;;  %v1271_v20 = vpop.permute.xlu0 %1270 }
 0x9d4   :  { %v1276_v25 = vsel %vm391_vm0, %v1271_v20, %v1274_v19 }
 0x9d6   :  { %v1282_v21 = vpop.permute.xlu1 %1281 }
 0x9d7   :  { %v1279_v22 = vpop.permute.xlu0 %1278 }
 0x9d8   :  { %v1284_v23 = vsel %vm391_vm0, %v1279_v22, %v1282_v21  ;;  %v1514_v21 = vrot.slane %v2806_v39, 6 }
 0x9d9   :  { %v1764_v24 = vmul.f32 -1.442695, %v1284_v23 }
 0x9db   :  { %2218 = vpow2.f32 %v1764_v24 }
 0x9dc   :  { %v2215_v26 = vpop.eup %2214  ;;  %2220 = vtanh.f32 %v1276_v25 }
 0x9dd   :  { %v2217_v27 = vpop.eup %2216  ;;  %v1267_v28 = vadd.f32 1.0, %v2215_v26 }
 0x9de   :  { %v1256_v29 = vadd.f32 1.0, %v2217_v27  ;;  %v1609_v27 = vld [vmem:[#allocation2 + $0x4] sm:$0x3] }
 0x9df   :  { %2222 = vrcp.f32 %v1267_v28 }
 0x9e0   :  { %2224 = vrcp.f32 %v1256_v29  ;;  %v1628_v29 = vld [vmem:[#allocation2 + $0x8] sm:$0x3] }
 0x9e5   :  { %v2219_v30 = vpop.eup %2218 }
 0x9e6   :  { %v2221_v31 = vpop.eup %2220  ;;  %v1288_v35 = vadd.f32 1.0, %v2219_v30  ;;  %v1591_v30 = vld [vmem:[#allocation2 + $0x2] sm:$0x3] }
 0x9e8   :  { %2226 = vrcp.f32 %v1288_v35 }
 0x9e9   :  { %v2223_v32 = vpop.eup %2222 }
 0x9ea   :  { %v2225_v34 = vpop.eup %2224  ;;  %v1291_v37 = vmul.f32 %v2223_v32, %v2962_v9 }
 0x9eb   :  { %v1292_v38 = vmul.f32 %v2225_v34, %v2221_v31  ;;  %v1627_v31 = vld [vmem:[#allocation2 + $0x6] sm:$0x3]  ;;  %v1645_v34 = vld [vmem:[#allocation2 + $0x8] sm:$0x3] }
 0x9ec   :  { %v3037_v33 = vsel %vm391_vm0, %v1627_v31, %v1628_v29 }
 0x9ed   :  { %v1293_v40 = vadd.f32 %v1292_v38, %v1291_v37  ;;  %v1630_v38 = vsel %vm623_vm3, %v3037_v33, 0.0 }
 0x9ef   :  { %2228 = vtanh.f32 %v1293_v40  ;;  %v1299_v44 = vsel %vm1298_vm8, %v1293_v40, %v2962_v9  ;;  %v1646_v40 = vld [vmem:[#allocation2 + $0x6] sm:$0x3] }
 0x9f2   :  { %v2227_v47 = vpop.eup %2226 }
 0x9f9   :  { %v2229_v48 = vpop.eup %2228 }
 0x9fa   :  { %v1295_v50 = vmul.f32 %v2229_v48, %v2227_v47  ;;  %v3044_v47 = vsel %vm391_vm0, %v1645_v34, %v1646_v40 }
 0x9fc   :  { %v1300_v51 = vsel %vm1298_vm8, %v1295_v50, %v2965_v13  ;;  %v1301_v53 = vsel %vm1298_vm8, %v1295_v50, 0.0 }
 0x9fd   :  { %1303 = vst.msk [vmem:[#allocation2 + $0xa] sm:$0x3] %vm623_vm3, %v1301_v53  ;;  %1766 = vmatmul.mubr.msk.f32.vlgmr.msra.gmra.mrb[12].mxu0 %vm491_vm2, %v1300_v51 }
 0xa04   :  { %v1610_v26 = vld [vmem:[#allocation2 + $0xa] sm:$0x3] }
 0xa05   :  { %v3029_v39 = vsel %vm391_vm0, %v1609_v27, %v1610_v26  ;;  %v1663_v35 = vld [vmem:[#allocation2 + $0xa] sm:$0x3] }
 0xad0   :  { %v1373_v56 = vpop.f32.mrb[12].mxu0 }
 0xad1   :  { %v1380_v59 = vadd.f32 %v1378_v54, %v1373_v56  ;;  %v1375_v60 = vpop.f32.mrb[13].mxu0  ;;  %v1682_v54 = vld [vmem:[#allocation2 + $0x2] sm:$0x3] }
 0xad2   :  { %v1383_v62 = vadd.f32 %v1381_v57, %v1375_v60 }
 0xad3   :  { %1396 = vrot.lane.b32.xlu1 %v1380_v59, %s2305_s23 }
 0xad4   :  { %1385 = vrot.lane.b32.xlu0 %v1383_v62, %s2304_s2 }
 0xad7   :  { %1409 = vrot.lane.b32.xlu1 %v1383_v62, %s2305_s23 }
 0xad8   :  { %1406 = vrot.lane.b32.xlu0 %v1380_v59, %s2303_s5 }
 0xadb   :  { %1417 = vrot.lane.b32.xlu1 %v1383_v62, %s2303_s5 }
 0xadc   :  { %1414 = vrot.lane.b32.xlu0 %v1380_v59, %s2304_s2 }
 0xb45   :  { %v1397_v63 = vpop.permute.xlu1 %1396 }
 0xb46   :  { %v1399_v1 = vsel %vm391_vm0, %v1397_v63, %v1383_v62  ;;  %v1386_v2 = vpop.permute.xlu0 %1385 }
 0xb47   :  { %v1768_v42 = vmul.f32 -1.442695, %v1399_v1  ;;  %v1388_v43 = vsel %vm391_vm0, %v1380_v59, %v1386_v2 }
 0xb48   :  { %v1767_v3 = vmul.f32 -1.442695, %v1388_v43 }
 0xb49   :  { %2230 = vpow2.f32 %v1768_v42  ;;  %v1410_v4 = vpop.permute.xlu1 %1409 }
 0xb4a   :  { %2232 = vpow2.f32 %v1767_v3  ;;  %v1407_v5 = vpop.permute.xlu0 %1406 }
 0xb4b   :  { %v1412_v9 = vsel %vm391_vm0, %v1407_v5, %v1410_v4 }
 0xb4d   :  { %v1418_v41 = vpop.permute.xlu1 %1417 }
 0xb4e   :  { %v1415_v6 = vpop.permute.xlu0 %1414 }
 0xb4f   :  { %v1420_v7 = vsel %vm391_vm0, %v1415_v6, %v1418_v41 }
 0xb50   :  { %v1769_v8 = vmul.f32 -1.442695, %v1420_v7 }
 0xb52   :  { %2234 = vpow2.f32 %v1769_v8 }
 0xb53   :  { %v2231_v10 = vpop.eup %2230  ;;  %2236 = vtanh.f32 %v1412_v9 }
 0xb54   :  { %v2233_v11 = vpop.eup %2232  ;;  %v1403_v12 = vadd.f32 1.0, %v2231_v10 }
 0xb55   :  { %v1392_v13 = vadd.f32 1.0, %v2233_v11 }
 0xb56   :  { %2238 = vrcp.f32 %v1403_v12 }
 0xb57   :  { %2240 = vrcp.f32 %v1392_v13 }
 0xb5c   :  { %v2235_v14 = vpop.eup %2234 }
 0xb5d   :  { %v2237_v15 = vpop.eup %2236  ;;  %v1424_v18 = vadd.f32 1.0, %v2235_v14 }
 0xb5f   :  { %2242 = vrcp.f32 %v1424_v18  ;;  %v1775_v18 = vld [vmem:[%s3167_s1 + $0xe] sm:$0x3] }
 0xb60   :  { %v2239_v16 = vpop.eup %2238  ;;  %vm1568_vm10 = vcmp.gt.f32.partialorder %v1775_v18, 0.5 }
 0xb61   :  { %v2241_v46 = vpop.eup %2240  ;;  %v1427_v45 = vmul.f32 %v2239_v16, %v1299_v44 }
 0xb62   :  { %v1428_v49 = vmul.f32 %v2241_v46, %v2237_v15 }
 0xb64   :  { %v1429_v52 = vadd.f32 %v1428_v49, %v1427_v45 }
 0xb66   :  { %2244 = vtanh.f32 %v1429_v52  ;;  %v3013_v55 = vsel %vm1434_vm9, %v1429_v52, %v1299_v44  ;;  %v1664_v44 = vld [vmem:[#allocation2 + $0x4] sm:$0x3] }
 0xb67   :  { %v3047_v48 = vsel %vm391_vm0, %v1663_v35, %v1664_v44 }
 0xb68   :  { %v1666_v53 = vsel %vm623_vm3, %v3047_v48, 0.0 }
 0xb69   :  { %v2243_v58 = vpop.eup %2242 }
 0xb70   :  { %v2245_v61 = vpop.eup %2244 }
 0xb71   :  { %v1431_v0 = vmul.f32 %v2245_v61, %v2243_v58 }
 0xb73   :  { %v3015_v19 = vsel %vm1434_vm9, %v1431_v0, %v1300_v51  ;;  %v1437_v20 = vsel %vm1434_vm9, %v1431_v0, 0.0  ;;  %v1648_v51 = vsel %vm623_vm3, %v3044_v47, 0.0 }
 0xb74   :  { %1439 = vst.msk [vmem:[#allocation2 + $0xc] sm:$0x3] %vm623_vm3, %v1437_v20  ;;  %1771 = vmatmul.mubr.msk.f32.vlgmr.msra.gmra.mrb[16].mxu1 %vm491_vm2, %v3015_v19 }
 0xb7b   :  { %v1592_v28 = vld [vmem:[#allocation2 + $0xc] sm:$0x3] }
 0xb7c   :  { %v3034_v32 = vsel %vm391_vm0, %v1591_v30, %v1592_v28  ;;  %v1681_v50 = vld [vmem:[#allocation2 + $0xc] sm:$0x3] }
 0xb7d   :  { %v1594_v37 = vsel %vm623_vm3, %v3034_v32, 0.0  ;;  %v3054_v56 = vsel %vm391_vm0, %v1681_v50, %v1682_v54 }
 0xb7e   :  { %v1684_v57 = vsel %vm623_vm3, %v3054_v56, 0.0 }
 0xc47   :  { %v1509_v22 = vpop.f32.mrb[16].mxu1 }
 0xc48   :  { %v1516_v23 = vadd.f32 %v1514_v21, %v1509_v22  ;;  %v1511_v24 = vpop.f32.mrb[17].mxu1 }
 0xc49   :  { %v1517_v25 = vadd.f32 %v1511_v24, %v2804_v36  ;;  %v1612_v36 = vsel %vm623_vm3, %v3029_v39, 0.0 }
 0xc4a   :  { %1530 = vrot.lane.b32.xlu1 %v1516_v23, %s2305_s23 }
 0xc4b   :  { %1519 = vrot.lane.b32.xlu0 %v1517_v25, %s2304_s2 }
 0xc4e   :  { %1543 = vrot.lane.b32.xlu1 %v1517_v25, %s2305_s23 }
 0xc4f   :  { %1540 = vrot.lane.b32.xlu0 %v1516_v23, %s2303_s5 }
 0xc52   :  { %1551 = vrot.lane.b32.xlu1 %v1517_v25, %s2303_s5 }
 0xc53   :  { %1548 = vrot.lane.b32.xlu0 %v1516_v23, %s2304_s2 }
 0xc72   :  { %1613 = vadd.xlane.f32.xlu0 %v1612_v36 }
 0xc76   :  { %1595 = vadd.xlane.f32.xlu1 %v1594_v37  ;;  %1631 = vadd.xlane.f32.xlu0 %v1630_v38 }
 0xc7a   :  { %1649 = vadd.xlane.f32.xlu1 %v1648_v51  ;;  %1667 = vadd.xlane.f32.xlu0 %v1666_v53 }
 0xc7e   :  { %1685 = vadd.xlane.f32.xlu1 %v1684_v57 }
 0xcbc   :  { %v1531_v59 = vpop.permute.xlu1 %1530 }
 0xcbd   :  { %v1533_v60 = vsel %vm391_vm0, %v1531_v59, %v1517_v25  ;;  %v1520_v62 = vpop.permute.xlu0 %1519 }
 0xcbe   :  { %v1773_v63 = vmul.f32 -1.442695, %v1533_v60  ;;  %v1522_v1 = vsel %vm391_vm0, %v1516_v23, %v1520_v62  ;;  %v1700_v23 = vld [vmem:[#allocation2] sm:$0x3] }
 0xcbf   :  { %v1772_v2 = vmul.f32 -1.442695, %v1522_v1 }
 0xcc0   :  { %2246 = vpow2.f32 %v1773_v63  ;;  %v1544_v42 = vpop.permute.xlu1 %1543 }
 0xcc1   :  { %2248 = vpow2.f32 %v1772_v2  ;;  %v1541_v43 = vpop.permute.xlu0 %1540 }
 0xcc2   :  { %v1546_v6 = vsel %vm391_vm0, %v1541_v43, %v1544_v42 }
 0xcc4   :  { %v1552_v3 = vpop.permute.xlu1 %1551 }
 0xcc5   :  { %v1549_v4 = vpop.permute.xlu0 %1548 }
 0xcc6   :  { %v1554_v5 = vsel %vm391_vm0, %v1549_v4, %v1552_v3 }
 0xcc7   :  { %v1774_v41 = vmul.f32 -1.442695, %v1554_v5 }
 0xcc9   :  { %2250 = vpow2.f32 %v1774_v41 }
 0xcca   :  { %v2247_v7 = vpop.eup %2246  ;;  %2252 = vtanh.f32 %v1546_v6 }
 0xccb   :  { %v2249_v8 = vpop.eup %2248  ;;  %v1537_v9 = vadd.f32 1.0, %v2247_v7 }
 0xccc   :  { %v1526_v10 = vadd.f32 1.0, %v2249_v8 }
 0xccd   :  { %2254 = vrcp.f32 %v1537_v9 }
 0xcce   :  { %2256 = vrcp.f32 %v1526_v10 }
 0xcd3   :  { %v2251_v11 = vpop.eup %2250 }
 0xcd4   :  { %v2253_v12 = vpop.eup %2252  ;;  %v1558_v16 = vadd.f32 1.0, %v2251_v11 }
 0xcd6   :  { %2258 = vrcp.f32 %v1558_v16 }
 0xcd7   :  { %v2255_v13 = vpop.eup %2254 }
 0xcd8   :  { %v2257_v14 = vpop.eup %2256  ;;  %v1561_v15 = vmul.f32 %v2255_v13, %v3013_v55  ;;  %v1574_v55 = vld [vmem:[#allocation2] sm:$0x3] }
 0xcd9   :  { %v1562_v17 = vmul.f32 %v2257_v14, %v2253_v12 }
 0xcdb   :  { %v1563_v46 = vadd.f32 %v1562_v17, %v1561_v15 }
 0xcdd   :  { %2260 = vtanh.f32 %v1563_v46 }
 0xce0   :  { %v2259_v45 = vpop.eup %2258 }
 0xce7   :  { %v2261_v49 = vpop.eup %2260 }
 0xce8   :  { %v1565_v52 = vmul.f32 %v2261_v49, %v2259_v45 }
 0xcea   :  { %v1570_v58 = vsel %vm1568_vm10, %v1565_v52, 0.0  ;;  %v1569_v61 = vsel %vm1568_vm10, %v1565_v52, %v3015_v19 }
 0xceb   :  { %1572 = vst.msk [vmem:[#allocation2 + $0xe] sm:$0x3] %vm623_vm3, %v1570_v58  ;;  %1573 = vst.msk [vmem:[#allocation3] sm:$0x3] %vm623_vm3, %v1569_v61 }
 0xcf2   :  { %v1575_v0 = vld [vmem:[#allocation2 + $0xe] sm:$0x3] }
 0xcf3   :  { %v1699_v20 = vld [vmem:[#allocation2 + $0xe] sm:$0x3]  ;;  %v1576_v21 = vsel %vm391_vm0, %v1574_v55, %v1575_v0 }
 0xcf4   :  { %v1577_v22 = vsel %vm623_vm3, %v1576_v21, 0.0  ;;  %v1701_v24 = vsel %vm391_vm0, %v1699_v20, %v1700_v23 }
 0xcf5   :  { %1578 = vadd.xlane.f32.xlu0 %v1577_v22  ;;  %v1702_v25 = vsel %vm623_vm3, %v1701_v24, 0.0 }
 0xcf9   :  { %1703 = vadd.xlane.f32.xlu0 %v1702_v25 }
 0xcff   :  { %v1614_v26 = vpop.xlane.xlu0 %1613 }
 0xd00   :  { %v1615_v19 = vmul.f32 0.015625, %v1614_v26 }
 0xd02   :  { %v3074_v27 = vsub.f32 %v3029_v39, %v1615_v19 }
 0xd03   :  { %v1596_v28 = vpop.xlane.xlu1 %1595  ;;  %v1632_v29 = vpop.xlane.xlu0 %1631 }
 0xd04   :  { %v1597_v36 = vmul.f32 0.015625, %v1596_v28  ;;  %v1633_v30 = vmul.f32 0.015625, %v1632_v29  ;;  %v1617_v31 = vmul.f32 %v3074_v27, %v3074_v27 }
 0xd06   :  { %v3079_v34 = vsub.f32 %v3034_v32, %v1597_v36  ;;  %v3082_v35 = vsub.f32 %v3037_v33, %v1633_v30  ;;  %v1618_v37 = vsel %vm623_vm3, %v1617_v31, 0.0 }
 0xd07   :  { %v1650_v38 = vpop.xlane.xlu1 %1649  ;;  %1619 = vadd.xlane.f32.xlu1 %v1618_v37  ;;  %v1668_v40 = vpop.xlane.xlu0 %1667 }
 0xd08   :  { %v1651_v39 = vmul.f32 0.015625, %v1650_v38  ;;  %v1669_v44 = vmul.f32 0.015625, %v1668_v40  ;;  %v1599_v50 = vmul.f32 %v3079_v34, %v3079_v34  ;;  %v1635_v33 = vmul.f32 %v3082_v35, %v3082_v35 }
 0xd0a   :  { %v1652_v51 = vsub.f32 %v3044_v47, %v1651_v39  ;;  %v3089_v53 = vsub.f32 %v3047_v48, %v1669_v44  ;;  %v1600_v32 = vsel %vm623_vm3, %v1599_v50, 0.0  ;;  %v1636_v59 = vsel %vm623_vm3, %v1635_v33, 0.0 }
 0xd0b   :  { %1601 = vadd.xlane.f32.xlu0 %v1600_v32  ;;  %v1686_v48 = vpop.xlane.xlu1 %1685 }
 0xd0c   :  { %v1653_v54 = vmul.f32 %v1652_v51, %v1652_v51  ;;  %v1671_v60 = vmul.f32 %v3089_v53, %v3089_v53  ;;  %v1687_v62 = vmul.f32 0.015625, %v1686_v48 }
 0xd0e   :  { %v1654_v57 = vsel %vm623_vm3, %v1653_v54, 0.0  ;;  %v1672_v47 = vsel %vm623_vm3, %v1671_v60, 0.0  ;;  %v3100_v2 = vsub.f32 %v3054_v56, %v1687_v62 }
 0xd0f   :  { %1655 = vadd.xlane.f32.xlu1 %v1654_v57  ;;  %1637 = vadd.xlane.f32.xlu0 %v1636_v59 }
 0xd10   :  { %v1689_v6 = vmul.f32 %v3100_v2, %v3100_v2 }
 0xd12   :  { %v1690_v56 = vsel %vm623_vm3, %v1689_v6, 0.0 }
 0xd13   :  { %1673 = vadd.xlane.f32.xlu0 %v1672_v47 }
 0xd82   :  { %v1579_v63 = vpop.xlane.xlu0 %1578 }
 0xd83   :  { %v1580_v1 = vmul.f32 0.015625, %v1579_v63 }
 0xd85   :  { %v3102_v42 = vsub.f32 %v1576_v21, %v1580_v1 }
 0xd86   :  { %v1704_v43 = vpop.xlane.xlu0 %1703 }
 0xd87   :  { %v1705_v3 = vmul.f32 0.015625, %v1704_v43  ;;  %v1582_v4 = vmul.f32 %v3102_v42, %v3102_v42 }
 0xd89   :  { %v3106_v5 = vsub.f32 %v1701_v24, %v1705_v3  ;;  %v1583_v41 = vsel %vm623_vm3, %v1582_v4, 0.0 }
 0xd8a   :  { %1584 = vadd.xlane.f32.xlu1 %v1583_v41 }
 0xd8b   :  { %v1707_v7 = vmul.f32 %v3106_v5, %v3106_v5 }
 0xd8d   :  { %v1708_v8 = vsel %vm623_vm3, %v1707_v7, 0.0 }
 0xd8e   :  { %1691 = vadd.xlane.f32.xlu1 %v1690_v56  ;;  %1709 = vadd.xlane.f32.xlu0 %v1708_v8 }
 0xd94   :  { %v1620_v9 = vpop.xlane.xlu1 %1619 }
 0xd95   :  { %v1621_v10 = vmul.f32 0.015625, %v1620_v9 }
 0xd97   :  { %v1622_v11 = vadd.f32 1e-05, %v1621_v10 }
 0xd98   :  { %v1602_v12 = vpop.xlane.xlu0 %1601 }
 0xd99   :  { %2262 = vrsqrt.f32 %v1622_v11  ;;  %v1603_v13 = vmul.f32 0.015625, %v1602_v12 }
 0xd9b   :  { %v1604_v14 = vadd.f32 1e-05, %v1603_v13 }
 0xd9c   :  { %v1656_v15 = vpop.xlane.xlu1 %1655  ;;  %v1638_v16 = vpop.xlane.xlu0 %1637 }
 0xd9d   :  { %2264 = vrsqrt.f32 %v1604_v14  ;;  %v1657_v17 = vmul.f32 0.015625, %v1656_v15  ;;  %v1639_v46 = vmul.f32 0.015625, %v1638_v16 }
 0xd9f   :  { %v1658_v18 = vadd.f32 1e-05, %v1657_v17  ;;  %v1640_v45 = vadd.f32 1e-05, %v1639_v46 }
 0xda0   :  { %v1674_v49 = vpop.xlane.xlu0 %1673 }
 0xda1   :  { %2266 = vrsqrt.f32 %v1658_v18  ;;  %v1675_v52 = vmul.f32 0.015625, %v1674_v49 }
 0xda2   :  { %2268 = vrsqrt.f32 %v1640_v45 }
 0xda3   :  { %v2263_v58 = vpop.eup %2262  ;;  %v1676_v61 = vadd.f32 1e-05, %v1675_v52 }
 0xda4   :  { %v1624_v55 = vmul.f32 %v2263_v58, %v3074_v27 }
 0xda5   :  { %2270 = vrsqrt.f32 %v1676_v61 }
 0xda6   :  { %1777 = vst.msk [vmem:[%s3173_s7 + $0x4] sm:$0x3] %vm623_vm3, %v1624_v55 }
 0xda7   :  { %v2265_v0 = vpop.eup %2264 }
 0xda8   :  { %v1606_v20 = vmul.f32 %v2265_v0, %v3079_v34 }
 0xdaa   :  { %1776 = vst.msk [vmem:[%s3173_s7 + $0x2] sm:$0x3] %vm623_vm3, %v1606_v20 }
 0xdab   :  { %v2267_v21 = vpop.eup %2266 }
 0xdac   :  { %v2269_v22 = vpop.eup %2268  ;;  %v1660_v23 = vmul.f32 %v2267_v21, %v1652_v51 }
 0xdad   :  { %v1642_v24 = vmul.f32 %v2269_v22, %v3082_v35 }
 0xdae   :  { %1779 = vst.msk [vmem:[%s3173_s7 + $0x8] sm:$0x3] %vm623_vm3, %v1660_v23 }
 0xdaf   :  { %2289 = shalt.err (!%p2286_p4)
}
 0xdb0   :  { %s2290_s2 = scalar_lea.hbm %s3174_s8, 32 }
 0xdb1   :  { %p2291_p5 = scmp.ne.s32.totalorder %s3174_s8, %s2290_s2  ;;  %p2294_p6 = scmp.lt.u32.totalorder %s2290_s2, %s3174_s8 }
 0xdb3   :  { %p2296_p7 = pnand %p2294_p6, %p2291_p5 }
 0xdb5   :  { %2299 = shalt.err (!%p2296_p7)
}
 0xdb6   :  { %1728 = dma.vmem_to_hbm [thread:$0]  %s1726_s21, 32, %s3174_s8, [#allocation4]   ;;  %v2271_v25 = vpop.eup %2270  ;;  %1778 = vst.msk [vmem:[%s3173_s7 + $0x6] sm:$0x3] %vm623_vm3, %v1642_v24 }
 0xdb7   :  { %v1678_v26 = vmul.f32 %v2271_v25, %v3089_v53 }
 0xdb9   :  { %1780 = vst.msk [vmem:[%s3173_s7 + $0xa] sm:$0x3] %vm623_vm3, %v1678_v26 }
 0xe17   :  { %v1585_v19 = vpop.xlane.xlu1 %1584 }
 0xe18   :  { %v1586_v27 = vmul.f32 0.015625, %v1585_v19 }
 0xe1a   :  { %v1587_v28 = vadd.f32 1e-05, %v1586_v27 }
 0xe1b   :  { %v1692_v29 = vpop.xlane.xlu1 %1691  ;;  %v1710_v36 = vpop.xlane.xlu0 %1709 }
 0xe1c   :  { %2272 = vrsqrt.f32 %v1587_v28  ;;  %v1693_v30 = vmul.f32 0.015625, %v1692_v29  ;;  %v1711_v31 = vmul.f32 0.015625, %v1710_v36 }
 0xe1e   :  { %v1694_v34 = vadd.f32 1e-05, %v1693_v30  ;;  %v1712_v35 = vadd.f32 1e-05, %v1711_v31 }
 0xe20   :  { %2274 = vrsqrt.f32 %v1694_v34 }
 0xe21   :  { %2276 = vrsqrt.f32 %v1712_v35 }
 0xe26   :  { %v2273_v37 = vpop.eup %2272 }
 0xe27   :  { %v1589_v38 = vmul.f32 %v2273_v37, %v3102_v42 }
 0xe29   :  { %1590 = vst.msk [vmem:[%s3173_s7] sm:$0x3] %vm623_vm3, %v1589_v38 }
 0xe2a   :  { %v2275_v40 = vpop.eup %2274 }
 0xe2b   :  { %v2277_v39 = vpop.eup %2276  ;;  %v1696_v44 = vmul.f32 %v2275_v40, %v3100_v2 }
 0xe2c   :  { %v1714_v50 = vmul.f32 %v2277_v39, %v3106_v5 }
 0xe2d   :  { %1781 = vst.msk [vmem:[%s3173_s7 + $0xc] sm:$0x3] %vm623_vm3, %v1696_v44 }
 0xe2e   :  { %1782 = vst.msk [vmem:[%s3173_s7 + $0xe] sm:$0x3] %vm623_vm3, %v1714_v50 }
 0xe2f   :  { %2300 = dma.done.wait [#allocation4], 32  }
 0xe30   :  { %2301 = vsyncadd [#allocation4], 4294967264 }
 0xe31   :  { %1734 = vsyncpa [#allocation4], 1 }

</bundles_post_ra>
